<compile_context>
chip_gen: v7x
topology: tpu7x:2x2x1
jax: 0.10.0
libtpu: 0.0.40
codegen_flags: <defaults>
</compile_context>

<pallas_src>
import math

import jax
import jax.numpy as jnp
import numpy as np
from jax.experimental import pallas as pl
from jax.experimental.pallas import tpu as pltpu

# ---- small hyperparameters, consistent with ResnetFC(d_in=8, d_latent=16, ...) ----
D_IN = 8
D_LATENT = 16
D_HIDDEN = 64
D_OUT = 4
N_BLOCKS = 3
T_CH = 16          # time_embed_ch
B = 2              # batch
P = 64             # points per batch element (multiple of 8 -> sublane-aligned batches)
R = B * P          # flattened rows processed in one invocation
D_ZX = D_LATENT + D_IN
HP = 128           # hidden dim zero-padded to a full 128-lane vreg
D_FUSED = (N_BLOCKS + 1) * HP   # 4 * 128 = 512 : lane-aligned fused matmul width


def _silu(x):
    return x * jax.nn.sigmoid(x)


def timestep_embedding(t, dim, max_period=10000):
    half = dim // 2
    freqs = jnp.exp(-math.log(max_period) * jnp.arange(half, dtype=jnp.float32) / half)
    args = t.astype(jnp.float32)[:, None] * freqs[None]
    emb = jnp.concatenate([jnp.cos(args), jnp.sin(args)], axis=-1)
    if dim % 2:
        emb = jnp.concatenate([emb, jnp.zeros_like(emb[:, :1])], axis=-1)
    return emb


# ----------------------------- Pallas kernel --------------------------------------
def resnetfc_kernel(zx_ref, emb_ref,
                    wzx_ref, bzx_ref,
                    w0_ref, w1_ref, b1_ref,
                    wout_ref, bout_ref,
                    out_ref):
    f32, bf16 = jnp.float32, jnp.bfloat16

    # Fused lin_in + all lin_z layers: one (R, 24) @ (24, 512) bf16 MXU pass, f32 acc.
    # Column block j occupies lanes [j*128, (j+1)*128) -> every slice below is a full
    # 128-lane vreg view (no sub-vreg lane extraction); padded upper 64 lanes stay 0.
    zx = zx_ref[...].astype(bf16)
    hz = jnp.dot(zx, wzx_ref[...], preferred_element_type=f32) + bzx_ref[...]
    h = hz[:, :HP]                                        # lin_in(x) + b_in

    for i in range(N_BLOCKS):                             # unrolled at trace time
        # latent injection: x = x + lin_z[i](z)
        h = h + hz[:, (i + 1) * HP:(i + 2) * HP]

        # Per-row time embedding (fc_0 bias already folded in). Rows are B-major, so a
        # sublane-aligned broadcast + concat reproduces the (R, HP) row layout from (B, HP).
        emb_blk = emb_ref[i]                              # (B, HP) f32
        emb_rows = jnp.concatenate(
            [jnp.broadcast_to(emb_blk[b:b + 1, :], (P, HP)) for b in range(B)], axis=0)

        # ResnetBlockFC (identity shortcut, ReLU activation):
        #   net = fc_0(relu(x)) ; dx = fc_1(relu(net + t_emb)) ; x = x + dx
        net = jnp.dot(jnp.maximum(h, 0.0).astype(bf16), w0_ref[i],
                      preferred_element_type=f32) + emb_rows
        dx = jnp.dot(jnp.maximum(net, 0.0).astype(bf16), w1_ref[i],
                     preferred_element_type=f32) + b1_ref[i]
        h = h + dx

    # Lane-dense (R, 128) store; the real D_OUT=4 columns are sliced out in the wrapper.
    out_ref[...] = jnp.dot(jnp.maximum(h, 0.0).astype(bf16), wout_ref[...],
                           preferred_element_type=f32) + bout_ref[...]


# ----------------------------- one-time weight packing ----------------------------
def prepare_params(p):
    """Hoisted out of the per-call path: fused lin_in/lin_z weight, 128-lane zero padding,
    bf16 casts of all MXU operands. Run once per parameter set."""
    f32, bf16 = jnp.float32, jnp.bfloat16

    wzx = jnp.zeros((D_ZX, D_FUSED), f32)
    wzx = wzx.at[D_LATENT:, :D_HIDDEN].set(p['Win'])                 # lin_in : x rows
    bzx = jnp.zeros((1, D_FUSED), f32).at[:, :D_HIDDEN].set(p['bin'])
    for i in range(N_BLOCKS):
        c = (i + 1) * HP
        wzx = wzx.at[:D_LATENT, c:c + D_HIDDEN].set(p['Wz'][i])      # lin_z_i: z rows
        bzx = bzx.at[:, c:c + D_HIDDEN].set(p['bz'][i])

    w0 = jnp.zeros((N_BLOCKS, HP, HP), f32).at[:, :D_HIDDEN, :D_HIDDEN].set(p['W0'])
    w1 = jnp.zeros((N_BLOCKS, HP, HP), f32).at[:, :D_HIDDEN, :D_HIDDEN].set(p['W1'])
    b1 = jnp.zeros((N_BLOCKS, 1, HP), f32).at[:, :, :D_HIDDEN].set(p['b1'])
    wout = jnp.zeros((HP, HP), f32).at[:D_HIDDEN, :D_OUT].set(p['Wout'])
    bout = jnp.zeros((1, HP), f32).at[:, :D_OUT].set(p['bout'])

    return {
        # small per-batch time-MLP params stay f32 (computed in plain JAX)
        'Wte0': p['Wte0'], 'bte0': p['bte0'], 'Wte1': p['Wte1'], 'bte1': p['bte1'],
        'Wt': p['Wt'], 'bt': p['bt'], 'b0': p['b0'],
        # packed / padded trunk weights for the kernel (bf16 MXU operands, f32 biases)
        'Wzx': wzx.astype(bf16), 'bzx': bzx,
        'W0p': w0.astype(bf16), 'W1p': w1.astype(bf16), 'b1p': b1,
        'Woutp': wout.astype(bf16), 'boutp': bout,
    }


# ----------------------------- wrapper -------------------------------------------
def resnetfc_forward(zx, t, mask, pp):
    # Per-batch glue in plain JAX (tiny): sinusoidal embedding + 2-layer time_embed MLP
    # + SiLU, the per-block t_emb Linear, and fc_0's bias folded into the embedding.
    temb = timestep_embedding(t, T_CH)
    temb = _silu(temb @ pp['Wte0'] + pp['bte0'])
    sil = _silu(temb @ pp['Wte1'] + pp['bte1'])                              # (B, T_CH)
    emb = jnp.einsum('bc,nch->nbh', sil, pp['Wt']) + pp['bt'] + pp['b0']     # (N, B, 64)
    emb = jnp.pad(emb, ((0, 0), (0, 0), (0, HP - D_HIDDEN)))                 # (N, B, 128)

    zx_flat = zx.reshape(R, D_ZX)

    vmem = pl.BlockSpec(memory_space=pltpu.MemorySpace.VMEM)
    out_pad = pl.pallas_call(
        resnetfc_kernel,
        out_shape=jax.ShapeDtypeStruct((R, HP), jnp.float32),
        in_specs=[vmem] * 9,
        out_specs=vmem,
    )(zx_flat, emb, pp['Wzx'], pp['bzx'], pp['W0p'], pp['W1p'], pp['b1p'],
      pp['Woutp'], pp['boutp'])

    out = out_pad[:, :D_OUT].reshape(B, P, D_OUT)

    # Mask validity: 512 floats -> plain JAX (a separate pallas_call costs more than the
    # reduction itself; XLA fuses this for free).
    m = mask.astype(jnp.float32)
    s = jnp.sum(m, axis=0)                                                   # (B, P)
    cnt = jnp.sum((s >= 2.0).astype(jnp.float32), axis=1, keepdims=True)
    valid = cnt > 8.0                                                        # (B, 1) bool
    return out, valid


# ----------------------------- params & reference --------------------------------
def init_params(key):
    keys = jax.random.split(key, 8)

    def kaiming(k, shape, fan_in):
        return jax.random.normal(k, shape, jnp.float32) * np.sqrt(2.0 / fan_in)

    p = {}
    p['Wte0'] = kaiming(keys[0], (T_CH, T_CH), T_CH)
    p['bte0'] = jnp.zeros((T_CH,), jnp.float32)
    p['Wte1'] = kaiming(keys[1], (T_CH, T_CH), T_CH)
    p['bte1'] = jnp.zeros((T_CH,), jnp.float32)
    p['Win'] = kaiming(keys[2], (D_IN, D_HIDDEN), D_IN)
    p['bin'] = jnp.zeros((1, D_HIDDEN), jnp.float32)
    p['Wz'] = kaiming(keys[3], (N_BLOCKS, D_LATENT, D_HIDDEN), D_LATENT)
    p['bz'] = jnp.zeros((N_BLOCKS, 1, D_HIDDEN), jnp.float32)
    p['Wt'] = kaiming(keys[4], (N_BLOCKS, T_CH, D_HIDDEN), T_CH)
    p['bt'] = jnp.zeros((N_BLOCKS, 1, D_HIDDEN), jnp.float32)
    p['W0'] = kaiming(keys[5], (N_BLOCKS, D_HIDDEN, D_HIDDEN), D_HIDDEN)
    p['b0'] = jnp.zeros((N_BLOCKS, 1, D_HIDDEN), jnp.float32)
    # NOTE: PyTorch zero-inits fc_1.weight; we use small deterministic random values so the
    # second matmul of each block is actually exercised (shapes identical). Documented.
    p['W1'] = 0.01 * jax.random.normal(keys[6], (N_BLOCKS, D_HIDDEN, D_HIDDEN), jnp.float32)
    p['b1'] = jnp.zeros((N_BLOCKS, 1, D_HIDDEN), jnp.float32)
    p['Wout'] = kaiming(keys[7], (D_HIDDEN, D_OUT), D_HIDDEN)
    p['bout'] = jnp.zeros((1, D_OUT), jnp.float32)
    return p


def ref_forward(zx, t, mask, p, matmul_dtype=jnp.float32):
    """Pure-JAX reference. matmul_dtype=bfloat16 reproduces the kernel's MXU operand
    rounding (accumulation stays f32 either way) for a tight structural check."""
    def mm(a, w):
        return jnp.dot(a.astype(matmul_dtype), w.astype(matmul_dtype),
                       preferred_element_type=jnp.float32)

    temb = timestep_embedding(t, T_CH)
    temb = _silu(temb @ p['Wte0'] + p['bte0'])
    sil = _silu(temb @ p['Wte1'] + p['bte1'])             # (B, T_CH)
    z = zx[..., :D_LATENT]
    x = mm(zx[..., D_LATENT:], p['Win']) + p['bin'][0]
    for i in range(N_BLOCKS):
        x = x + (mm(z, p['Wz'][i]) + p['bz'][i][0])
        emb = (sil @ p['Wt'][i] + p['bt'][i][0])[:, None, :]
        net = mm(jnp.maximum(x, 0.0), p['W0'][i]) + p['b0'][i][0]
        dx = mm(jnp.maximum(net + emb, 0.0), p['W1'][i]) + p['b1'][i][0]
        x = x + dx
    out = mm(jnp.maximum(x, 0.0), p['Wout']) + p['bout'][0]
    m = mask.astype(jnp.float32)
    s = jnp.sum(jnp.transpose(m, (1, 2, 0)), axis=2)      # (B, P)
    cnt = jnp.sum((s >= 2).astype(jnp.float32), axis=1, keepdims=True)
    valid = cnt > 8
    return out, valid


if __name__ == "__main__":
    key = jax.random.PRNGKey(0)
    kp, kzx, km = jax.random.split(key, 3)
    params = init_params(kp)
    prepared = prepare_params(params)        # one-time packing, hoisted out of the forward

    zx = jax.random.normal(kzx, (B, P, D_ZX), jnp.float32)
    t = jnp.arange(B, dtype=jnp.float32) * 7.0 + 3.0
    mask = (jax.random.uniform(km, (4, B, P)) > 0.3).astype(jnp.float32)

    fwd = jax.jit(resnetfc_forward)
    out, valid = fwd(zx, t, mask, prepared)
    out = jax.block_until_ready(out)
    valid = jax.block_until_ready(valid)

    ref_out, ref_valid = ref_forward(zx, t, mask, params)                       # f32 module
    ref_out_q, _ = ref_forward(zx, t, mask, params, matmul_dtype=jnp.bfloat16)  # kernel rounding

    assert out.shape == (B, P, D_OUT) and valid.shape == (B, 1)
    out_np = np.asarray(out)
    ref_np = np.asarray(ref_out)
    refq_np = np.asarray(ref_out_q)
    err_q = float(np.max(np.abs(out_np - refq_np)))
    err_f = float(np.max(np.abs(out_np - ref_np)))
    # Tight structural check against the reference with identical bf16 operand rounding.
    assert np.allclose(out_np, refq_np, rtol=5e-3, atol=5e-3), err_q
    # Documented loose bound against the pure-f32 module reference (bf16 MXU operands).
    assert np.allclose(out_np, ref_np, rtol=5e-2, atol=1e-1), err_f
    assert np.array_equal(np.asarray(valid), np.asarray(ref_valid))
    print("KERNEL_OK")
</pallas_src>

<mosaic_0001>
module attributes {stable_mosaic.version = 11 : i64} {
  func.func @resnetfc_kernel(%arg0: memref<128x24xf32, #tpu.memory_space<vmem>>, %arg1: memref<3x2x128xf32, #tpu.memory_space<vmem>>, %arg2: memref<24x512xbf16, #tpu.memory_space<vmem>>, %arg3: memref<1x512xf32, #tpu.memory_space<vmem>>, %arg4: memref<3x128x128xbf16, #tpu.memory_space<vmem>>, %arg5: memref<3x128x128xbf16, #tpu.memory_space<vmem>>, %arg6: memref<3x1x128xf32, #tpu.memory_space<vmem>>, %arg7: memref<128x128xbf16, #tpu.memory_space<vmem>>, %arg8: memref<1x128xf32, #tpu.memory_space<vmem>>, %arg9: memref<128x128xf32, #tpu.memory_space<vmem>>) attributes {dimension_semantics = [], scalar_prefetch = 0 : i64, scratch_operands = 0 : i64, tpu.core_type = #tpu.core_type<tc>} {
    %c0 = arith.constant 0 : index
    %c0_0 = arith.constant 0 : index
    %0 = vector.load %arg0[%c0, %c0_0] : memref<128x24xf32, #tpu.memory_space<vmem>>, vector<128x24xf32>
    %1 = arith.truncf %0 : vector<128x24xf32> to vector<128x24xbf16>
    %c0_1 = arith.constant 0 : index
    %c0_2 = arith.constant 0 : index
    %2 = vector.load %arg2[%c0_1, %c0_2] : memref<24x512xbf16, #tpu.memory_space<vmem>>, vector<24x512xbf16>
    %cst = arith.constant dense<0.000000e+00> : vector<128x512xf32>
    %3 = tpu.matmul %1, %2, %cst {dimension_numbers = #tpu.dot_dimension_numbers<[1], [0], [0], [1], [0, 0, 1, 1], [], []>} : vector<128x24xbf16>, vector<24x512xbf16>, vector<128x512xf32> -> vector<128x512xf32>
    %c0_3 = arith.constant 0 : index
    %c0_4 = arith.constant 0 : index
    %4 = vector.load %arg3[%c0_3, %c0_4] : memref<1x512xf32, #tpu.memory_space<vmem>>, vector<1x512xf32>
    %5 = vector.broadcast %4 : vector<1x512xf32> to vector<128x512xf32>
    %6 = arith.addf %3, %5 : vector<128x512xf32>
    %7 = vector.extract_strided_slice %6 {offsets = [0, 0], sizes = [128, 128], strides = [1, 1]} : vector<128x512xf32> to vector<128x128xf32>
    %8 = vector.extract_strided_slice %6 {offsets = [0, 128], sizes = [128, 128], strides = [1, 1]} : vector<128x512xf32> to vector<128x128xf32>
    %9 = arith.addf %7, %8 : vector<128x128xf32>
    %c0_5 = arith.constant 0 : index
    %c0_6 = arith.constant 0 : index
    %c0_7 = arith.constant 0 : index
    %10 = vector.load %arg1[%c0_5, %c0_6, %c0_7] : memref<3x2x128xf32, #tpu.memory_space<vmem>>, vector<1x2x128xf32>
    %11 = vector.shape_cast %10 : vector<1x2x128xf32> to vector<2x128xf32>
    %12 = vector.extract_strided_slice %11 {offsets = [0, 0], sizes = [1, 128], strides = [1, 1]} : vector<2x128xf32> to vector<1x128xf32>
    %13 = vector.shape_cast %12 : vector<1x128xf32> to vector<1x128xf32>
    %14 = vector.broadcast %13 : vector<1x128xf32> to vector<64x128xf32>
    %15 = vector.extract_strided_slice %11 {offsets = [1, 0], sizes = [1, 128], strides = [1, 1]} : vector<2x128xf32> to vector<1x128xf32>
    %16 = vector.shape_cast %15 : vector<1x128xf32> to vector<1x128xf32>
    %17 = vector.broadcast %16 : vector<1x128xf32> to vector<64x128xf32>
    %18 = tpu.concatenate %14, %17 in 0 : vector<64x128xf32>, vector<64x128xf32> -> vector<128x128xf32>
    %cst_8 = arith.constant 0.000000e+00 : f32
    %19 = vector.broadcast %cst_8 : f32 to vector<128x128xf32>
    %20 = arith.maximumf %9, %19 : vector<128x128xf32>
    %21 = arith.truncf %20 : vector<128x128xf32> to vector<128x128xbf16>
    %c0_9 = arith.constant 0 : index
    %c0_10 = arith.constant 0 : index
    %c0_11 = arith.constant 0 : index
    %22 = vector.load %arg4[%c0_9, %c0_10, %c0_11] : memref<3x128x128xbf16, #tpu.memory_space<vmem>>, vector<1x128x128xbf16>
    %23 = vector.shape_cast %22 : vector<1x128x128xbf16> to vector<128x128xbf16>
    %cst_12 = arith.constant dense<0.000000e+00> : vector<128x128xf32>
    %24 = tpu.matmul %21, %23, %cst_12 {dimension_numbers = #tpu.dot_dimension_numbers<[1], [0], [0], [1], [0, 0, 1, 1], [], []>} : vector<128x128xbf16>, vector<128x128xbf16>, vector<128x128xf32> -> vector<128x128xf32>
    %25 = arith.addf %24, %18 : vector<128x128xf32>
    %cst_13 = arith.constant 0.000000e+00 : f32
    %26 = vector.broadcast %cst_13 : f32 to vector<128x128xf32>
    %27 = arith.maximumf %25, %26 : vector<128x128xf32>
    %28 = arith.truncf %27 : vector<128x128xf32> to vector<128x128xbf16>
    %c0_14 = arith.constant 0 : index
    %c0_15 = arith.constant 0 : index
    %c0_16 = arith.constant 0 : index
    %29 = vector.load %arg5[%c0_14, %c0_15, %c0_16] : memref<3x128x128xbf16, #tpu.memory_space<vmem>>, vector<1x128x128xbf16>
    %30 = vector.shape_cast %29 : vector<1x128x128xbf16> to vector<128x128xbf16>
    %cst_17 = arith.constant dense<0.000000e+00> : vector<128x128xf32>
    %31 = tpu.matmul %28, %30, %cst_17 {dimension_numbers = #tpu.dot_dimension_numbers<[1], [0], [0], [1], [0, 0, 1, 1], [], []>} : vector<128x128xbf16>, vector<128x128xbf16>, vector<128x128xf32> -> vector<128x128xf32>
    %c0_18 = arith.constant 0 : index
    %c0_19 = arith.constant 0 : index
    %c0_20 = arith.constant 0 : index
    %32 = vector.load %arg6[%c0_18, %c0_19, %c0_20] : memref<3x1x128xf32, #tpu.memory_space<vmem>>, vector<1x1x128xf32>
    %33 = vector.shape_cast %32 : vector<1x1x128xf32> to vector<1x128xf32>
    %34 = vector.broadcast %33 : vector<1x128xf32> to vector<128x128xf32>
    %35 = arith.addf %31, %34 : vector<128x128xf32>
    %36 = arith.addf %9, %35 : vector<128x128xf32>
    %37 = vector.extract_strided_slice %6 {offsets = [0, 256], sizes = [128, 128], strides = [1, 1]} : vector<128x512xf32> to vector<128x128xf32>
    %38 = arith.addf %36, %37 : vector<128x128xf32>
    %c1 = arith.constant 1 : index
    %c0_21 = arith.constant 0 : index
    %c0_22 = arith.constant 0 : index
    %39 = vector.load %arg1[%c1, %c0_21, %c0_22] : memref<3x2x128xf32, #tpu.memory_space<vmem>>, vector<1x2x128xf32>
    %40 = vector.shape_cast %39 : vector<1x2x128xf32> to vector<2x128xf32>
    %41 = vector.extract_strided_slice %40 {offsets = [0, 0], sizes = [1, 128], strides = [1, 1]} : vector<2x128xf32> to vector<1x128xf32>
    %42 = vector.shape_cast %41 : vector<1x128xf32> to vector<1x128xf32>
    %43 = vector.broadcast %42 : vector<1x128xf32> to vector<64x128xf32>
    %44 = vector.extract_strided_slice %40 {offsets = [1, 0], sizes = [1, 128], strides = [1, 1]} : vector<2x128xf32> to vector<1x128xf32>
    %45 = vector.shape_cast %44 : vector<1x128xf32> to vector<1x128xf32>
    %46 = vector.broadcast %45 : vector<1x128xf32> to vector<64x128xf32>
    %47 = tpu.concatenate %43, %46 in 0 : vector<64x128xf32>, vector<64x128xf32> -> vector<128x128xf32>
    %cst_23 = arith.constant 0.000000e+00 : f32
    %48 = vector.broadcast %cst_23 : f32 to vector<128x128xf32>
    %49 = arith.maximumf %38, %48 : vector<128x128xf32>
    %50 = arith.truncf %49 : vector<128x128xf32> to vector<128x128xbf16>
    %c1_24 = arith.constant 1 : index
    %c0_25 = arith.constant 0 : index
    %c0_26 = arith.constant 0 : index
    %51 = vector.load %arg4[%c1_24, %c0_25, %c0_26] : memref<3x128x128xbf16, #tpu.memory_space<vmem>>, vector<1x128x128xbf16>
    %52 = vector.shape_cast %51 : vector<1x128x128xbf16> to vector<128x128xbf16>
    %cst_27 = arith.constant dense<0.000000e+00> : vector<128x128xf32>
    %53 = tpu.matmul %50, %52, %cst_27 {dimension_numbers = #tpu.dot_dimension_numbers<[1], [0], [0], [1], [0, 0, 1, 1], [], []>} : vector<128x128xbf16>, vector<128x128xbf16>, vector<128x128xf32> -> vector<128x128xf32>
    %54 = arith.addf %53, %47 : vector<128x128xf32>
    %cst_28 = arith.constant 0.000000e+00 : f32
    %55 = vector.broadcast %cst_28 : f32 to vector<128x128xf32>
    %56 = arith.maximumf %54, %55 : vector<128x128xf32>
    %57 = arith.truncf %56 : vector<128x128xf32> to vector<128x128xbf16>
    %c1_29 = arith.constant 1 : index
    %c0_30 = arith.constant 0 : index
    %c0_31 = arith.constant 0 : index
    %58 = vector.load %arg5[%c1_29, %c0_30, %c0_31] : memref<3x128x128xbf16, #tpu.memory_space<vmem>>, vector<1x128x128xbf16>
    %59 = vector.shape_cast %58 : vector<1x128x128xbf16> to vector<128x128xbf16>
    %cst_32 = arith.constant dense<0.000000e+00> : vector<128x128xf32>
    %60 = tpu.matmul %57, %59, %cst_32 {dimension_numbers = #tpu.dot_dimension_numbers<[1], [0], [0], [1], [0, 0, 1, 1], [], []>} : vector<128x128xbf16>, vector<128x128xbf16>, vector<128x128xf32> -> vector<128x128xf32>
    %c1_33 = arith.constant 1 : index
    %c0_34 = arith.constant 0 : index
    %c0_35 = arith.constant 0 : index
    %61 = vector.load %arg6[%c1_33, %c0_34, %c0_35] : memref<3x1x128xf32, #tpu.memory_space<vmem>>, vector<1x1x128xf32>
    %62 = vector.shape_cast %61 : vector<1x1x128xf32> to vector<1x128xf32>
    %63 = vector.broadcast %62 : vector<1x128xf32> to vector<128x128xf32>
    %64 = arith.addf %60, %63 : vector<128x128xf32>
    %65 = arith.addf %38, %64 : vector<128x128xf32>
    %66 = vector.extract_strided_slice %6 {offsets = [0, 384], sizes = [128, 128], strides = [1, 1]} : vector<128x512xf32> to vector<128x128xf32>
    %67 = arith.addf %65, %66 : vector<128x128xf32>
    %c2 = arith.constant 2 : index
    %c0_36 = arith.constant 0 : index
    %c0_37 = arith.constant 0 : index
    %68 = vector.load %arg1[%c2, %c0_36, %c0_37] : memref<3x2x128xf32, #tpu.memory_space<vmem>>, vector<1x2x128xf32>
    %69 = vector.shape_cast %68 : vector<1x2x128xf32> to vector<2x128xf32>
    %70 = vector.extract_strided_slice %69 {offsets = [0, 0], sizes = [1, 128], strides = [1, 1]} : vector<2x128xf32> to vector<1x128xf32>
    %71 = vector.shape_cast %70 : vector<1x128xf32> to vector<1x128xf32>
    %72 = vector.broadcast %71 : vector<1x128xf32> to vector<64x128xf32>
    %73 = vector.extract_strided_slice %69 {offsets = [1, 0], sizes = [1, 128], strides = [1, 1]} : vector<2x128xf32> to vector<1x128xf32>
    %74 = vector.shape_cast %73 : vector<1x128xf32> to vector<1x128xf32>
    %75 = vector.broadcast %74 : vector<1x128xf32> to vector<64x128xf32>
    %76 = tpu.concatenate %72, %75 in 0 : vector<64x128xf32>, vector<64x128xf32> -> vector<128x128xf32>
    %cst_38 = arith.constant 0.000000e+00 : f32
    %77 = vector.broadcast %cst_38 : f32 to vector<128x128xf32>
    %78 = arith.maximumf %67, %77 : vector<128x128xf32>
    %79 = arith.truncf %78 : vector<128x128xf32> to vector<128x128xbf16>
    %c2_39 = arith.constant 2 : index
    %c0_40 = arith.constant 0 : index
    %c0_41 = arith.constant 0 : index
    %80 = vector.load %arg4[%c2_39, %c0_40, %c0_41] : memref<3x128x128xbf16, #tpu.memory_space<vmem>>, vector<1x128x128xbf16>
    %81 = vector.shape_cast %80 : vector<1x128x128xbf16> to vector<128x128xbf16>
    %cst_42 = arith.constant dense<0.000000e+00> : vector<128x128xf32>
    %82 = tpu.matmul %79, %81, %cst_42 {dimension_numbers = #tpu.dot_dimension_numbers<[1], [0], [0], [1], [0, 0, 1, 1], [], []>} : vector<128x128xbf16>, vector<128x128xbf16>, vector<128x128xf32> -> vector<128x128xf32>
    %83 = arith.addf %82, %76 : vector<128x128xf32>
    %cst_43 = arith.constant 0.000000e+00 : f32
    %84 = vector.broadcast %cst_43 : f32 to vector<128x128xf32>
    %85 = arith.maximumf %83, %84 : vector<128x128xf32>
    %86 = arith.truncf %85 : vector<128x128xf32> to vector<128x128xbf16>
    %c2_44 = arith.constant 2 : index
    %c0_45 = arith.constant 0 : index
    %c0_46 = arith.constant 0 : index
    %87 = vector.load %arg5[%c2_44, %c0_45, %c0_46] : memref<3x128x128xbf16, #tpu.memory_space<vmem>>, vector<1x128x128xbf16>
    %88 = vector.shape_cast %87 : vector<1x128x128xbf16> to vector<128x128xbf16>
    %cst_47 = arith.constant dense<0.000000e+00> : vector<128x128xf32>
    %89 = tpu.matmul %86, %88, %cst_47 {dimension_numbers = #tpu.dot_dimension_numbers<[1], [0], [0], [1], [0, 0, 1, 1], [], []>} : vector<128x128xbf16>, vector<128x128xbf16>, vector<128x128xf32> -> vector<128x128xf32>
    %c2_48 = arith.constant 2 : index
    %c0_49 = arith.constant 0 : index
    %c0_50 = arith.constant 0 : index
    %90 = vector.load %arg6[%c2_48, %c0_49, %c0_50] : memref<3x1x128xf32, #tpu.memory_space<vmem>>, vector<1x1x128xf32>
    %91 = vector.shape_cast %90 : vector<1x1x128xf32> to vector<1x128xf32>
    %92 = vector.broadcast %91 : vector<1x128xf32> to vector<128x128xf32>
    %93 = arith.addf %89, %92 : vector<128x128xf32>
    %94 = arith.addf %67, %93 : vector<128x128xf32>
    %cst_51 = arith.constant 0.000000e+00 : f32
    %95 = vector.broadcast %cst_51 : f32 to vector<128x128xf32>
    %96 = arith.maximumf %94, %95 : vector<128x128xf32>
    %97 = arith.truncf %96 : vector<128x128xf32> to vector<128x128xbf16>
    %c0_52 = arith.constant 0 : index
    %c0_53 = arith.constant 0 : index
    %98 = vector.load %arg7[%c0_52, %c0_53] : memref<128x128xbf16, #tpu.memory_space<vmem>>, vector<128x128xbf16>
    %cst_54 = arith.constant dense<0.000000e+00> : vector<128x128xf32>
    %99 = tpu.matmul %97, %98, %cst_54 {dimension_numbers = #tpu.dot_dimension_numbers<[1], [0], [0], [1], [0, 0, 1, 1], [], []>} : vector<128x128xbf16>, vector<128x128xbf16>, vector<128x128xf32> -> vector<128x128xf32>
    %c0_55 = arith.constant 0 : index
    %c0_56 = arith.constant 0 : index
    %100 = vector.load %arg8[%c0_55, %c0_56] : memref<1x128xf32, #tpu.memory_space<vmem>>, vector<1x128xf32>
    %101 = vector.broadcast %100 : vector<1x128xf32> to vector<128x128xf32>
    %102 = arith.addf %99, %101 : vector<128x128xf32>
    %c0_57 = arith.constant 0 : index
    %c0_58 = arith.constant 0 : index
    %103 = vector.load %arg9[%c0_57, %c0_58] : memref<128x128xf32, #tpu.memory_space<vmem>>, vector<128x128xf32>
    tpu.vector_store %arg9[%c0_57, %c0_58], %102 {strides = array<i32>} : memref<128x128xf32, #tpu.memory_space<vmem>>, vector<128x128xf32>,
    return
  }
}

</mosaic_0001>

<bundles_post_ra>
// kernel: resnetfc_forward.1
= control target key start
LH: loop header
LB: loop body
LE: loop exit
PB: predicated region body
PF: predicated region fallthrough
CT: control target
= control target key end

     0   :  { %14 = vsyncpa [#allocation3], 0  ;;  %s3305_s0 = inlined_call_operand.vmem [shape: f32[128,24], index: 0, kind: input, shape index: {}]   ;;  %s3306_s1 = inlined_call_operand.vmem [shape: f32[3,2,128], index: 1, kind: input, shape index: {}]   ;;  %s3307_s2 = inlined_call_operand.vmem [shape: bf16[24,512], index: 2, kind: input, shape index: {}]   ;;  %s3308_s3 = inlined_call_operand.vmem [shape: f32[1,512], index: 3, kind: input, shape index: {}]   ;;  %s3309_s4 = inlined_call_operand.vmem [shape: bf16[3,128,128], index: 4, kind: input, shape index: {}]   ;;  %s3310_s5 = inlined_call_operand.hbm [shape: bf16[3,128,128], index: 5, kind: input, shape index: {}]   ;;  %s3311_s6 = inlined_call_operand.hbm [shape: f32[3,1,128], index: 6, kind: input, shape index: {}]   ;;  %s3312_s7 = inlined_call_operand.vmem [shape: bf16[128,128], index: 7, kind: input, shape index: {}]   ;;  %s3313_s8 = inlined_call_operand.hbm [shape: f32[1,128], index: 8, kind: input, shape index: {}]   ;;  %s3314_s9 = inlined_call_operand.vmem [shape: f32[128,128], index: 9, kind: output, shape index: {}]  }
   0x1   :  { %15 = vsyncpa [#allocation5], 0  ;;  %s2498_s30 = smov [#allocation4]   ;;  %s2428_s13 = scalar_lea.hbm %s3311_s6, 48 }
   0x2   :  { %s43_s10 = sshll.u32 %s2498_s30, 4  ;;  %p2429_p0 = scmp.ne.s32.totalorder %s3311_s6, %s2428_s13  ;;  %s44_s10 = int_to_ptr.vmem [resolvable:$true] %s43_s10 }
   0x3   :  { %p2432_p1 = scmp.lt.u32.totalorder %s2428_s13, %s3311_s6 }
   0x5   :  { %p2434_p2 = pnand %p2432_p1, %p2429_p0 }
   0x7   :  { %2437 = shalt.err (!%p2434_p2)
}
   0x8   :  { %s2438_s18 = scalar_lea.vmem %s44_s10, 48  ;;  %s2442_s19 = scalar_lea.vmem %s44_s10, 64 }
   0x9   :  { %p2439_p3 = scmp.ne.s32.totalorder %s44_s10, %s2438_s18  ;;  %p2443_p4 = scmp.lt.s32.totalorder %s44_s10, %s44_s10 }
   0xa   :  { %p2444_p5 = scmp.lt.s32.totalorder %s2442_s19, %s2438_s18 }
   0xc   :  { %p2445_p6 = por %p2444_p5, %p2443_p4 }
   0xe   :  { %p2446_p7 = pnand %p2445_p6, %p2439_p3 }
  0x10   :  { %2449 = shalt.err (!%p2446_p7)
}
  0x11   :  { %s2499_s20 = smov 16   ;;  %s2500_s21 = smov 1  }
  0x12   :  { %49 = dma.hbm_to_vmem [thread:$0]  %s3311_s6, 48, %s44_s10, [#allocation5], %s2499_s20, %s2499_s20, %s2500_s21  }
  0x13   :  { %s2501_s24 = smov [#allocation2]   ;;  %s2450_s28 = scalar_lea.hbm %s3310_s5, 3072 }
  0x14   :  { %s31_s25 = sshll.u32 %s2501_s24, 4  ;;  %p2451_p8 = scmp.ne.s32.totalorder %s3310_s5, %s2450_s28  ;;  %s32_s25 = int_to_ptr.vmem [resolvable:$true] %s31_s25 }
  0x15   :  { %p2454_p9 = scmp.lt.u32.totalorder %s2450_s28, %s3310_s5 }
  0x17   :  { %p2456_p10 = pnand %p2454_p9, %p2451_p8 }
  0x19   :  { %2459 = shalt.err (!%p2456_p10)
}
  0x1a   :  { %s2460_s13 = scalar_lea.vmem %s32_s25, 3072  ;;  %p2465_p12 = scmp.lt.s32.totalorder %s32_s25, %s32_s25 }
  0x1b   :  { %p2461_p11 = scmp.ne.s32.totalorder %s32_s25, %s2460_s13  ;;  %p2466_p13 = scmp.lt.s32.totalorder %s2460_s13, %s2460_s13 }
  0x1d   :  { %p2467_p0 = por %p2466_p13, %p2465_p12 }
  0x1f   :  { %p2468_p1 = pnand %p2467_p0, %p2461_p11 }
  0x21   :  { %2471 = shalt.err (!%p2468_p1)
}
  0x22   :  { %s2502_s6 = smov 64   ;;  %s2503_s10 = smov 4  }
  0x23   :  { %37 = dma.hbm_to_vmem [thread:$0]  %s3310_s5, 3072, %s32_s25, [#allocation3], %s2502_s6, %s2502_s6, %s2503_s10  }
  0x24   :  { %s2504_s16 = smov [#allocation6]   ;;  %s2472_s20 = scalar_lea.hbm %s3313_s8, 16 }
  0x25   :  { %s58_s17 = sshll.u32 %s2504_s16, 4  ;;  %p2473_p2 = scmp.ne.s32.totalorder %s3313_s8, %s2472_s20  ;;  %s59_s17 = int_to_ptr.vmem [resolvable:$true] %s58_s17 }
  0x26   :  { %p2476_p3 = scmp.lt.u32.totalorder %s2472_s20, %s3313_s8 }
  0x28   :  { %p2478_p4 = pnand %p2476_p3, %p2473_p2 }
  0x2a   :  { %2481 = shalt.err (!%p2478_p4)
}
  0x2b   :  { %s2482_s26 = scalar_lea.vmem %s59_s17, 16  ;;  %s2486_s5 = scalar_lea.vmem %s59_s17, 32 }
  0x2c   :  { %p2483_p5 = scmp.ne.s32.totalorder %s59_s17, %s2482_s26  ;;  %p2487_p6 = scmp.lt.s32.totalorder %s59_s17, %s59_s17 }
  0x2d   :  { %p2488_p7 = scmp.lt.s32.totalorder %s2486_s5, %s2482_s26 }
  0x2f   :  { %p2489_p8 = por %p2488_p7, %p2487_p6 }
  0x31   :  { %p2490_p9 = pnand %p2489_p8, %p2483_p5 }
  0x33   :  { %2493 = shalt.err (!%p2490_p9)
}
  0x34   :  { %61 = dma.hbm_to_vmem [thread:$0]  %s3313_s8, 16, %s59_s17, [#allocation5]  }
  0x35   :  { %2494 = dma.done.wait [#allocation3], 3072  }
  0x36   :  { %2495 = vsyncadd [#allocation3], 4294964224 }
  0x37   :  { %2496 = dma.done.wait [#allocation5], 64  }
  0x38   :  { %2497 = vsyncadd [#allocation5], 4294967232  ;;  %v2505_v0 = vmov 0   ;;  %v2362_v1 = vld [vmem:[%s3307_s2 + $0x4] ss:$16 sps:$4 sm:$0xff]   ;;  %vm179_vm0 = vcmask 1043456   ;;  %v104_v51 = vlaneseq }
  0x39   :  { %224 = vmatprep.mubr.bf16.mxu0 %v2505_v0  ;;  %284 = vmatprep.mubr.bf16.mxu1 %v2505_v0  ;;  %v2364_v2 = vld [vmem:[%s3307_s2] ss:$16 sps:$4 sm:$0xff]   ;;  %v73_v7 = vld [vmem:[%s3305_s0 + $0x8] sm:$0xff]  ;;  %vm154_vm1 = vcmask 195584   ;;  %v75_v15 = vld [vmem:[%s3305_s0 + $0x18] sm:$0xff] }
  0x3a   :  { %v100_v3 = vld [vmem:[%s3307_s2 + $0x20] sm:$0xff]  ;;  %192 = vmatprep.subr.bf16.mxu0 %v2362_v1  ;;  %2350 = vmatprep.subr.bf16.mxu1 %v2362_v1  ;;  %v85_v10 = vld [vmem:[%s3305_s0 + $0x68] sm:$0xff]  ;;  %v74_v14 = vld [vmem:[%s3305_s0 + $0x10] sm:$0xff]  ;;  %v2730_v52 = vshrl.u32 %v104_v51, 7 }
  0x3b   :  { %v1899_v4 = vcombine.high %v100_v3, %v100_v3  ;;  %v1898_v5 = vcombine.low %v100_v3, %v100_v3  ;;  %193 = vmatpush1.bf16.msra.mxu0 %v2364_v2  ;;  %v72_v6 = vld [vmem:[%s3305_s0] sm:$0xff]  ;;  %2352 = vmatpush1.bf16.msra.mxu1 %v2364_v2  ;;  %v86_v16 = vld [vmem:[%s3305_s0 + $0x70] sm:$0xff]  ;;  %v2368_v17 = vld [vmem:[%s3309_s4 + $0x8] sm:$0xff]   ;;  %v2649_v20 = vpack.c.bf16 %v75_v15, %v74_v14 }
  0x3c   :  { %v84_v9 = vld [vmem:[%s3305_s0 + $0x60] sm:$0xff]  ;;  %v2618_v11 = vpack.c.bf16 %v73_v7, %v72_v6  ;;  %v87_v18 = vld [vmem:[%s3305_s0 + $0x78] sm:$0xff]  ;;  %v2369_v19 = vld [vmem:[%s3309_s4 + $0x10] sm:$0xff]   ;;  %v2736_v53 = vsub.s32 0, %v2730_v52  ;;  %v2744_v55 = vsub.s32 1, %v2730_v52 }
  0x3d   :  { %1902 = vmatprep.subr.msk.bf16.mxu0 %vm179_vm0, %v1899_v4  ;;  %v181_v8 = vsel %vm179_vm0, %v1898_v5, 0  ;;  %2351 = vmatprep.subr.msk.bf16.mxu1 %vm179_vm0, %v1899_v4  ;;  %v2620_v12 = vpack.c.bf16 %v85_v10, %v84_v9  ;;  %v2367_v13 = vld [vmem:[%s3309_s4] sm:$0xff]   ;;  %v2651_v21 = vpack.c.bf16 %v87_v18, %v86_v16  ;;  %v77_v23 = vld [vmem:[%s3305_s0 + $0x28] sm:$0xff]  ;;  %v78_v25 = vld [vmem:[%s3305_s0 + $0x30] sm:$0xff] }
  0x3e   :  { %v76_v22 = vld [vmem:[%s3305_s0 + $0x20] sm:$0xff]  ;;  %v79_v26 = vld [vmem:[%s3305_s0 + $0x38] sm:$0xff]  ;;  %v81_v29 = vld [vmem:[%s3305_s0 + $0x48] sm:$0xff] }
  0x3f   :  { %195 = vmatpush1.bf16.msra.mxu0 %v181_v8  ;;  %2353 = vmatpush1.bf16.msra.mxu1 %v181_v8  ;;  %v90_v24 = vpack.c.bf16 %v77_v23, %v76_v22  ;;  %v91_v27 = vpack.c.bf16 %v79_v26, %v78_v25  ;;  %v80_v28 = vld [vmem:[%s3305_s0 + $0x40] sm:$0xff]  ;;  %v82_v31 = vld [vmem:[%s3305_s0 + $0x50] sm:$0xff]  ;;  %v83_v32 = vld [vmem:[%s3305_s0 + $0x58] sm:$0xff] }
  0x40   :  { %2126 = vmatprep.subr.bf16.mxu0 %v2367_v13  ;;  %v92_v30 = vpack.c.bf16 %v81_v29, %v80_v28  ;;  %v93_v33 = vpack.c.bf16 %v83_v32, %v82_v31  ;;  %v2370_v34 = vld [vmem:[%s3309_s4 + $0x18] sm:$0xff]   ;;  %v2371_v35 = vld [vmem:[%s3309_s4 + $0x20] sm:$0xff]   ;;  %v2372_v36 = vld [vmem:[%s3309_s4 + $0x28] sm:$0xff]  }
  0x41   :  { %v2373_v37 = vld [vmem:[%s3309_s4 + $0x30] sm:$0xff]   ;;  %v2374_v38 = vld [vmem:[%s3309_s4 + $0x38] sm:$0xff]   ;;  %v101_v41 = vld [vmem:[%s3307_s2 + $0x28] sm:$0xff] }
  0x42   :  { %1903 = vmatmul.mubr.msk.bf16.vlgmr.msra.gmra.mrb[0].mxu0 %vm154_vm1, %v2618_v11  ;;  %1909 = vmatmul.mubr.msk.bf16.vlgmr.msra.gmra.mrb[0].mxu1 %vm154_vm1, %v2620_v12  ;;  %v2375_v39 = vld [vmem:[%s3307_s2 + $0x8] ss:$16 sps:$4 sm:$0xff]   ;;  %v2377_v40 = vld [vmem:[%s3307_s2 + $0xc] ss:$16 sps:$4 sm:$0xff]   ;;  %v1901_v42 = vcombine.high %v101_v41, %v101_v41  ;;  %v1900_v43 = vcombine.low %v101_v41, %v101_v41  ;;  %v2380_v45 = vld [vmem:[#allocation2] sm:$0xff]  }
  0x43   :  { %234 = vmatprep.mubr.bf16.mxu0 %v2505_v0  ;;  %294 = vmatprep.mubr.bf16.mxu1 %v2505_v0  ;;  %v2381_v46 = vld [vmem:[#allocation2 + $0x8] sm:$0xff]   ;;  %v2382_v47 = vld [vmem:[#allocation2 + $0x10] sm:$0xff]   ;;  %v2383_v48 = vld [vmem:[#allocation2 + $0x18] sm:$0xff]  }
  0x44   :  { %2127 = vmatpush3.bf16.msra.mxu0 %v2367_v13  ;;  %305 = vmatprep.subr.bf16.mxu1 %v2377_v40  ;;  %v187_v44 = vsel %vm179_vm0, %v1900_v43, 0  ;;  %v2384_v49 = vld [vmem:[#allocation2 + $0x20] sm:$0xff]   ;;  %v2385_v50 = vld [vmem:[#allocation2 + $0x28] sm:$0xff]  }
  0x45   :  { %2128 = vmatprep.subr.bf16.mxu0 %v2368_v17  ;;  %306 = vmatpush1.bf16.msra.mxu1 %v2375_v39  ;;  %v2741_v54 = vld [vmem:[%s3308_s3] sm:$0xf] }
  0x46   :  { %1911 = vmatprep.subr.msk.bf16.mxu1 %vm179_vm0, %v1901_v42  ;;  %v2748_v56 = vrot.slane %v2741_v54, %v2736_v53  ;;  %v2752_v57 = vrot.slane %v2741_v54, %v2744_v55 }
  0x48   :  { %2129 = vmatpush3.bf16.msra.mxu0 %v2368_v17 }
  0x49   :  { %2130 = vmatprep.subr.bf16.mxu0 %v2369_v19  ;;  %308 = vmatpush1.bf16.msra.mxu1 %v187_v44 }
  0x4a   :  { %1904 = vmatmul.mubr.msk.bf16.gmra.mrb[4].mxu0 %vm154_vm1, %v2649_v20  ;;  %1910 = vmatmul.mubr.msk.bf16.gmra.mrb[4].mxu1 %vm154_vm1, %v2651_v21 }
  0x4b   :  { %244 = vmatprep.mubr.bf16.mxu0 %v2505_v0  ;;  %337 = vmatprep.mubr.bf16.mxu1 %v2505_v0 }
  0x4c   :  { %2131 = vmatpush3.bf16.msra.mxu0 %v2369_v19  ;;  %2158 = vmatprep.subr.bf16.mxu1 %v2380_v45 }
  0x4d   :  { %2132 = vmatprep.subr.bf16.mxu0 %v2370_v34 }
  0x50   :  { %2133 = vmatpush3.bf16.msra.mxu0 %v2370_v34 }
  0x51   :  { %2134 = vmatprep.subr.bf16.mxu0 %v2371_v35 }
  0x52   :  { %1905 = vmatmul.mubr.msk.bf16.gmra.mrb[8].mxu0 %vm154_vm1, %v90_v24  ;;  %1912 = vmatmul.mubr.msk.bf16.vlgmr.msra.gmra.mrb[8].mxu1 %vm154_vm1, %v2618_v11 }
  0x53   :  { %254 = vmatprep.mubr.bf16.mxu0 %v2505_v0  ;;  %347 = vmatprep.mubr.bf16.mxu1 %v2505_v0 }
  0x54   :  { %2135 = vmatpush3.bf16.msra.mxu0 %v2371_v35  ;;  %2159 = vmatpush3.bf16.msra.mxu1 %v2380_v45 }
  0x55   :  { %2136 = vmatprep.subr.bf16.mxu0 %v2372_v36  ;;  %2160 = vmatprep.subr.bf16.mxu1 %v2381_v46 }
  0x58   :  { %2137 = vmatpush3.bf16.msra.mxu0 %v2372_v36  ;;  %2161 = vmatpush3.bf16.msra.mxu1 %v2381_v46 }
  0x59   :  { %2138 = vmatprep.subr.bf16.mxu0 %v2373_v37  ;;  %2162 = vmatprep.subr.bf16.mxu1 %v2382_v47 }
  0x5a   :  { %1906 = vmatmul.mubr.msk.bf16.gmra.mrb[12].mxu0 %vm154_vm1, %v91_v27  ;;  %1913 = vmatmul.mubr.msk.bf16.gmra.mrb[12].mxu1 %vm154_vm1, %v2649_v20 }
  0x5b   :  { %264 = vmatprep.mubr.bf16.mxu0 %v2505_v0  ;;  %357 = vmatprep.mubr.bf16.mxu1 %v2505_v0 }
  0x5c   :  { %2139 = vmatpush3.bf16.msra.mxu0 %v2373_v37  ;;  %2163 = vmatpush3.bf16.msra.mxu1 %v2382_v47 }
  0x5d   :  { %2140 = vmatprep.subr.bf16.mxu0 %v2374_v38  ;;  %2164 = vmatprep.subr.bf16.mxu1 %v2383_v48 }
  0x60   :  { %2141 = vmatpush3.bf16.msra.mxu0 %v2374_v38  ;;  %2165 = vmatpush3.bf16.msra.mxu1 %v2383_v48 }
  0x61   :  { %2166 = vmatprep.subr.bf16.mxu1 %v2384_v49 }
  0x62   :  { %1907 = vmatmul.mubr.msk.bf16.gmra.mrb[16].mxu0 %vm154_vm1, %v92_v30  ;;  %1914 = vmatmul.mubr.msk.bf16.gmra.mrb[16].mxu1 %vm154_vm1, %v90_v24 }
  0x63   :  { %274 = vmatprep.mubr.bf16.mxu0 %v2505_v0  ;;  %367 = vmatprep.mubr.bf16.mxu1 %v2505_v0 }
  0x64   :  { %2167 = vmatpush3.bf16.msra.mxu1 %v2384_v49 }
  0x65   :  { %2168 = vmatprep.subr.bf16.mxu1 %v2385_v50 }
  0x68   :  { %2169 = vmatpush3.bf16.msra.mxu1 %v2385_v50 }
  0x6a   :  { %1908 = vmatmul.mubr.msk.bf16.gmra.mrb[20].mxu0 %vm154_vm1, %v93_v33  ;;  %1915 = vmatmul.mubr.msk.bf16.gmra.mrb[20].mxu1 %vm154_vm1, %v91_v27 }
  0x6b   :  { %377 = vmatprep.mubr.bf16.mxu1 %v2505_v0 }
  0x72   :  { %1916 = vmatmul.mubr.msk.bf16.gmra.mrb[24].mxu1 %vm154_vm1, %v92_v30 }
  0x73   :  { %387 = vmatprep.mubr.bf16.mxu1 %v2505_v0 }
  0x7a   :  { %1917 = vmatmul.mubr.msk.bf16.gmra.mrb[28].mxu1 %vm154_vm1, %v93_v33 }
  0x7b   :  { %397 = vmatprep.mubr.bf16.mxu1 %v2505_v0 }
  0x82   :  { %1918 = vmatmul.mubr.msk.bf16.gmra.mrb[32].mxu1 %vm154_vm1, %v2620_v12 }
  0x83   :  { %407 = vmatprep.mubr.bf16.mxu1 %v2505_v0 }
  0x8a   :  { %1919 = vmatmul.mubr.msk.bf16.gmra.mrb[36].mxu1 %vm154_vm1, %v2651_v21 }
 0x115   :  { %v226_v58 = vpop.f32.mrb[0].mxu0  ;;  %v286_v59 = vpop.f32.mrb[0].mxu1 }
 0x116   :  { %v227_v60 = vadd.f32 %v226_v58, %v2748_v56  ;;  %v228_v61 = vpop.f32.mrb[1].mxu0  ;;  %v287_v62 = vadd.f32 %v286_v59, %v2748_v56  ;;  %v288_v63 = vpop.f32.mrb[1].mxu1 }
 0x117   :  { %v229_v0 = vadd.f32 %v228_v61, %v2752_v57  ;;  %v230_v1 = vpop.f32.mrb[2].mxu0  ;;  %v289_v2 = vadd.f32 %v288_v63, %v2752_v57  ;;  %v290_v3 = vpop.f32.mrb[2].mxu1 }
 0x118   :  { %v231_v4 = vadd.f32 %v230_v1, %v2748_v56  ;;  %v232_v5 = vpop.f32.mrb[3].mxu0  ;;  %v291_v6 = vadd.f32 %v290_v3, %v2748_v56  ;;  %v292_v7 = vpop.f32.mrb[3].mxu1 }
 0x119   :  { %v2762_v8 = vadd.f32 %v229_v0, %v227_v60  ;;  %v233_v9 = vadd.f32 %v232_v5, %v2752_v57  ;;  %v2765_v10 = vadd.f32 %v289_v2, %v287_v62  ;;  %v293_v11 = vadd.f32 %v292_v7, %v2752_v57 }
 0x11b   :  { %v2768_v12 = vadd.f32 %v233_v9, %v231_v4  ;;  %v2770_v13 = vadd.f32 %v293_v11, %v291_v6  ;;  %v443_v14 = vmax.f32 %v2762_v8, 0.0 }
 0x11d   :  { %v444_v15 = vmax.f32 %v2768_v12, 0.0  ;;  %v236_v16 = vpop.f32.mrb[4].mxu0  ;;  %v296_v17 = vpop.f32.mrb[4].mxu1 }
 0x11e   :  { %v237_v18 = vadd.f32 %v236_v16, %v2748_v56  ;;  %v238_v19 = vpop.f32.mrb[5].mxu0  ;;  %v297_v20 = vadd.f32 %v296_v17, %v2748_v56  ;;  %v298_v21 = vpop.f32.mrb[5].mxu1 }
 0x11f   :  { %v239_v22 = vadd.f32 %v238_v19, %v2752_v57  ;;  %v240_v23 = vpop.f32.mrb[6].mxu0  ;;  %v459_v24 = vpack.c.bf16 %v444_v15, %v443_v14  ;;  %v299_v25 = vadd.f32 %v298_v21, %v2752_v57  ;;  %v300_v26 = vpop.f32.mrb[6].mxu1 }
 0x120   :  { %v241_v27 = vadd.f32 %v240_v23, %v2748_v56  ;;  %v242_v28 = vpop.f32.mrb[7].mxu0  ;;  %v301_v29 = vadd.f32 %v300_v26, %v2748_v56  ;;  %v302_v30 = vpop.f32.mrb[7].mxu1 }
 0x121   :  { %v2780_v31 = vadd.f32 %v239_v22, %v237_v18  ;;  %v243_v32 = vadd.f32 %v242_v28, %v2752_v57  ;;  %2142 = vmatprep.mubr.bf16.mxu0 %v459_v24  ;;  %v2783_v33 = vadd.f32 %v299_v25, %v297_v20  ;;  %v303_v34 = vadd.f32 %v302_v30, %v2752_v57 }
 0x123   :  { %v2786_v35 = vadd.f32 %v243_v32, %v241_v27  ;;  %v2788_v36 = vadd.f32 %v303_v34, %v301_v29  ;;  %v445_v37 = vmax.f32 %v2780_v31, 0.0 }
 0x125   :  { %v446_v38 = vmax.f32 %v2786_v35, 0.0  ;;  %v246_v39 = vpop.f32.mrb[8].mxu0 }
 0x126   :  { %v247_v40 = vadd.f32 %v246_v39, %v2748_v56  ;;  %v248_v41 = vpop.f32.mrb[9].mxu0  ;;  %v455_v39 = vmax.f32 %v2765_v10, 0.0 }
 0x127   :  { %v460_v42 = vpack.c.bf16 %v446_v38, %v445_v37  ;;  %v249_v43 = vadd.f32 %v248_v41, %v2752_v57  ;;  %v250_v44 = vpop.f32.mrb[10].mxu0 }
 0x128   :  { %v251_v45 = vadd.f32 %v250_v44, %v2748_v56  ;;  %v252_v46 = vpop.f32.mrb[11].mxu0 }
 0x129   :  { %v2795_v47 = vadd.f32 %v249_v43, %v247_v40  ;;  %v253_v48 = vadd.f32 %v252_v46, %v2752_v57  ;;  %2143 = vmatmul.mubr.bf16.vlgmr.msra.gmra.mrb[24].mxu0 %v460_v42  ;;  %v456_v40 = vmax.f32 %v2770_v13, 0.0  ;;  %v2386_v46 = vld [vmem:[#allocation2 + $0x30] sm:$0xff]  }
 0x12a   :  { %2170 = vmatprep.subr.bf16.mxu1 %v2386_v46 }
 0x12b   :  { %v2798_v49 = vadd.f32 %v253_v48, %v251_v45  ;;  %v447_v50 = vmax.f32 %v2795_v47, 0.0  ;;  %v465_v44 = vpack.c.bf16 %v456_v40, %v455_v39  ;;  %v458_v45 = vmax.f32 %v2788_v36, 0.0  ;;  %2171 = vmatpush3.bf16.msra.mxu1 %v2386_v46  ;;  %v2387_v48 = vld [vmem:[#allocation2 + $0x38] sm:$0xff]  }
 0x12c   :  { %2172 = vmatprep.subr.bf16.mxu1 %v2387_v48 }
 0x12d   :  { %v448_v51 = vmax.f32 %v2798_v49, 0.0  ;;  %v256_v58 = vpop.f32.mrb[12].mxu0 }
 0x12e   :  { %v257_v59 = vadd.f32 %v256_v58, %v2748_v56  ;;  %v258_v60 = vpop.f32.mrb[13].mxu0  ;;  %v2389_v58 = vld [vmem:[%s3309_s4 + $0x48] sm:$0xff]  }
 0x12f   :  { %v259_v61 = vadd.f32 %v258_v60, %v2752_v57  ;;  %v260_v62 = vpop.f32.mrb[14].mxu0  ;;  %v461_v63 = vpack.c.bf16 %v448_v51, %v447_v50  ;;  %2173 = vmatpush3.bf16.msra.mxu1 %v2387_v48  ;;  %v2836_v50 = vpop.f32.mrb[8].mxu1  ;;  %v2388_v51 = vld [vmem:[%s3309_s4 + $0x40] sm:$0xff]  }
 0x130   :  { %v261_v0 = vadd.f32 %v260_v62, %v2748_v56  ;;  %v262_v1 = vpop.f32.mrb[15].mxu0  ;;  %2190 = vmatprep.subr.bf16.mxu0 %v2388_v51  ;;  %v2390_v62 = vld [vmem:[%s3309_s4 + $0x50] sm:$0xff]  }
 0x131   :  { %v2805_v2 = vadd.f32 %v259_v61, %v257_v59  ;;  %v263_v3 = vadd.f32 %v262_v1, %v2752_v57  ;;  %2146 = vmatprep.mubr.bf16.mxu0 %v461_v63  ;;  %v2844_v59 = vpop.f32.mrb[9].mxu1  ;;  %2191 = vmatpush3.bf16.msra.mxu0 %v2388_v51  ;;  %v2391_v1 = vld [vmem:[%s3309_s4 + $0x58] sm:$0xff]  }
 0x132   :  { %v2846_v60 = vpop.f32.mrb[10].mxu1  ;;  %2192 = vmatprep.subr.bf16.mxu0 %v2389_v58 }
 0x133   :  { %v2808_v4 = vadd.f32 %v263_v3, %v261_v0  ;;  %v449_v5 = vmax.f32 %v2805_v2, 0.0  ;;  %v2848_v61 = vpop.f32.mrb[11].mxu1 }
 0x134   :  { %v2853_v63 = vpop.f32.mrb[12].mxu1 }
 0x135   :  { %v450_v6 = vmax.f32 %v2808_v4, 0.0  ;;  %v266_v7 = vpop.f32.mrb[16].mxu0  ;;  %2193 = vmatpush3.bf16.msra.mxu0 %v2389_v58  ;;  %v2855_v0 = vpop.f32.mrb[13].mxu1 }
 0x136   :  { %v267_v9 = vadd.f32 %v266_v7, %v2748_v56  ;;  %v268_v11 = vpop.f32.mrb[17].mxu0  ;;  %2194 = vmatprep.subr.bf16.mxu0 %v2390_v62  ;;  %v2860_v3 = vpop.f32.mrb[14].mxu1 }
 0x137   :  { %v269_v14 = vadd.f32 %v268_v11, %v2752_v57  ;;  %v270_v15 = vpop.f32.mrb[18].mxu0  ;;  %v462_v16 = vpack.c.bf16 %v450_v6, %v449_v5  ;;  %v2862_v5 = vpop.f32.mrb[15].mxu1  ;;  %v2392_v6 = vld [vmem:[%s3309_s4 + $0x60] sm:$0xff]  }
 0x138   :  { %v271_v17 = vadd.f32 %v270_v15, %v2748_v56  ;;  %v272_v18 = vpop.f32.mrb[19].mxu0  ;;  %v2867_v7 = vpop.f32.mrb[16].mxu1 }
 0x139   :  { %v2815_v19 = vadd.f32 %v269_v14, %v267_v9  ;;  %v273_v20 = vadd.f32 %v272_v18, %v2752_v57  ;;  %2147 = vmatmul.mubr.bf16.gmra.mrb[28].mxu0 %v462_v16  ;;  %v2869_v9 = vpop.f32.mrb[17].mxu1 }
 0x13a   :  { %2195 = vmatpush3.bf16.msra.mxu0 %v2390_v62  ;;  %3315 = vst [vmem:[#allocation9_spill] sm:$0xff] %v2869_v9  ;;  %v2871_v11 = vpop.f32.mrb[18].mxu1 }
 0x13b   :  { %v2818_v21 = vadd.f32 %v273_v20, %v271_v17  ;;  %v451_v22 = vmax.f32 %v2815_v19, 0.0  ;;  %2196 = vmatprep.subr.bf16.mxu0 %v2391_v1  ;;  %v2873_v14 = vpop.f32.mrb[19].mxu1 }
 0x13c   :  { %3316 = vst [vmem:[#allocation10_spill] sm:$0xff] %v2873_v14 }
 0x13d   :  { %v452_v23 = vmax.f32 %v2818_v21, 0.0  ;;  %v276_v24 = vpop.f32.mrb[20].mxu0  ;;  %v2875_v15 = vpop.f32.mrb[20].mxu1 }
 0x13e   :  { %v277_v25 = vadd.f32 %v276_v24, %v2748_v56  ;;  %v278_v26 = vpop.f32.mrb[21].mxu0  ;;  %2197 = vmatpush3.bf16.msra.mxu0 %v2391_v1  ;;  %v2877_v16 = vpop.f32.mrb[21].mxu1 }
 0x13f   :  { %v279_v27 = vadd.f32 %v278_v26, %v2752_v57  ;;  %v280_v28 = vpop.f32.mrb[22].mxu0  ;;  %v463_v29 = vpack.c.bf16 %v452_v23, %v451_v22  ;;  %2198 = vmatprep.subr.bf16.mxu0 %v2392_v6  ;;  %3317 = vst [vmem:[#allocation11_spill] sm:$0xff] %v2877_v16  ;;  %v2879_v17 = vpop.f32.mrb[22].mxu1 }
 0x140   :  { %v281_v30 = vadd.f32 %v280_v28, %v2748_v56  ;;  %v282_v32 = vpop.f32.mrb[23].mxu0  ;;  %v457_v56 = vmax.f32 %v2783_v33, 0.0  ;;  %v2881_v18 = vpop.f32.mrb[23].mxu1 }
 0x141   :  { %v2825_v34 = vadd.f32 %v279_v27, %v277_v25  ;;  %v283_v37 = vadd.f32 %v282_v32, %v2752_v57  ;;  %2150 = vmatprep.mubr.bf16.mxu0 %v463_v29  ;;  %3318 = vst [vmem:[#allocation12_spill] sm:$0xff] %v2881_v18 }
 0x142   :  { %v466_v57 = vpack.c.bf16 %v458_v45, %v457_v56  ;;  %2199 = vmatpush3.bf16.msra.mxu0 %v2392_v6 }
 0x143   :  { %v2828_v38 = vadd.f32 %v283_v37, %v281_v30  ;;  %v453_v41 = vmax.f32 %v2825_v34, 0.0 }
 0x145   :  { %v454_v42 = vmax.f32 %v2828_v38, 0.0  ;;  %v2883_v20 = vpop.f32.mrb[24].mxu1 }
 0x146   :  { %v2885_v22 = vpop.f32.mrb[25].mxu1 }
 0x147   :  { %v464_v43 = vpack.c.bf16 %v454_v42, %v453_v41  ;;  %3319 = vst [vmem:[#allocation13_spill] sm:$0xff] %v2885_v22  ;;  %v2887_v23 = vpop.f32.mrb[26].mxu1 }
 0x148   :  { %v2889_v24 = vpop.f32.mrb[27].mxu1 }
 0x149   :  { %2151 = vmatmul.mubr.bf16.gmra.mrb[32].mxu0 %v464_v43  ;;  %3320 = vst [vmem:[#allocation14_spill] sm:$0xff] %v2889_v24  ;;  %v434_v43 = vld [vmem:[%s3306_s1] sm:$0x3] }
 0x14a   :  { %2154 = vmatprep.mubr.bf16.mxu0 %v465_v44  ;;  %v438_v44 = vrot.slane %v434_v43, %v2736_v53 }
 0x14d   :  { %v2891_v25 = vpop.f32.mrb[28].mxu1 }
 0x14e   :  { %v2893_v26 = vpop.f32.mrb[29].mxu1 }
 0x14f   :  { %3321 = vst [vmem:[#allocation15_spill] sm:$0xff] %v2893_v26  ;;  %v2895_v27 = vpop.f32.mrb[30].mxu1 }
 0x150   :  { %v2897_v28 = vpop.f32.mrb[31].mxu1 }
 0x151   :  { %2155 = vmatmul.mubr.bf16.gmra.mrb[36].mxu0 %v466_v57  ;;  %3322 = vst [vmem:[#allocation16_spill] sm:$0xff] %v2897_v28 }
 0x155   :  { %v2899_v29 = vpop.f32.mrb[32].mxu1 }
 0x156   :  { %v2901_v30 = vpop.f32.mrb[33].mxu1 }
 0x157   :  { %3323 = vst [vmem:[#allocation17_spill] sm:$0xff] %v2901_v30  ;;  %v2903_v32 = vpop.f32.mrb[34].mxu1 }
 0x158   :  { %v2905_v37 = vpop.f32.mrb[35].mxu1 }
 0x159   :  { %3324 = vst [vmem:[#allocation18_spill] sm:$0xff] %v2905_v37 }
 0x15d   :  { %v2907_v39 = vpop.f32.mrb[36].mxu1 }
 0x15e   :  { %v2909_v40 = vpop.f32.mrb[37].mxu1 }
 0x15f   :  { %3325 = vst [vmem:[#allocation19_spill] sm:$0xff] %v2909_v40  ;;  %v2911_v41 = vpop.f32.mrb[38].mxu1 }
 0x160   :  { %v2913_v42 = vpop.f32.mrb[39].mxu1 }
 0x161   :  { %3326 = vst [vmem:[#allocation20_spill] sm:$0xff] %v2913_v42 }
 0x1fc   :  { %v2144_v56 = vpop.f32.mrb[24].mxu0 }
 0x1fd   :  { %v574_v45 = vadd.f32 %v2144_v56, %v438_v44  ;;  %v565_v57 = vpop.f32.mrb[25].mxu0 }
 0x1fe   :  { %v566_v46 = vadd.f32 %v565_v57, %v438_v44  ;;  %v2145_v48 = vpop.f32.mrb[26].mxu0 }
 0x1ff   :  { %v577_v51 = vadd.f32 %v2145_v48, %v438_v44  ;;  %v568_v58 = vpop.f32.mrb[27].mxu0  ;;  %v630_v1 = vmax.f32 %v574_v45, 0.0 }
 0x200   :  { %v569_v62 = vadd.f32 %v568_v58, %v438_v44  ;;  %v628_v37 = vmax.f32 %v566_v46, 0.0 }
 0x201   :  { %v631_v6 = vmax.f32 %v577_v51, 0.0 }
 0x202   :  { %v629_v30 = vmax.f32 %v569_v62, 0.0 }
 0x203   :  { %v645_v40 = vpack.c.bf16 %v631_v6, %v630_v1 }
 0x204   :  { %v644_v42 = vpack.c.bf16 %v629_v30, %v628_v37  ;;  %v442_v30 = vrot.slane %v434_v43, %v2744_v55 }
 0x206   :  { %2174 = vmatprep.mubr.bf16.mxu1 %v644_v42 }
 0x207   :  { %2175 = vmatmul.mubr.bf16.vlgmr.msra.gmra.mrb[40].mxu1 %v645_v40 }
 0x20c   :  { %v2148_v24 = vpop.f32.mrb[28].mxu0 }
 0x20d   :  { %v590_v28 = vadd.f32 %v2148_v24, %v438_v44  ;;  %v581_v22 = vpop.f32.mrb[29].mxu0 }
 0x20e   :  { %v582_v26 = vadd.f32 %v581_v22, %v438_v44  ;;  %v2149_v14 = vpop.f32.mrb[30].mxu0 }
 0x20f   :  { %v593_v56 = vadd.f32 %v2149_v14, %v438_v44  ;;  %v584_v18 = vpop.f32.mrb[31].mxu0  ;;  %v634_v9 = vmax.f32 %v590_v28, 0.0 }
 0x210   :  { %v585_v57 = vadd.f32 %v584_v18, %v438_v44  ;;  %v632_v16 = vmax.f32 %v582_v26, 0.0 }
 0x211   :  { %v635_v48 = vmax.f32 %v593_v56, 0.0 }
 0x212   :  { %v633_v58 = vmax.f32 %v585_v57, 0.0 }
 0x213   :  { %v647_v45 = vpack.c.bf16 %v635_v48, %v634_v9 }
 0x214   :  { %v646_v51 = vpack.c.bf16 %v633_v58, %v632_v16 }
 0x216   :  { %2178 = vmatprep.mubr.bf16.mxu1 %v646_v51 }
 0x217   :  { %2179 = vmatmul.mubr.bf16.gmra.mrb[44].mxu1 %v647_v45 }
 0x21c   :  { %v2152_v37 = vpop.f32.mrb[32].mxu0 }
 0x21d   :  { %v606_v40 = vadd.f32 %v2152_v37, %v442_v30  ;;  %v597_v42 = vpop.f32.mrb[33].mxu0 }
 0x21e   :  { %v598_v24 = vadd.f32 %v597_v42, %v442_v30  ;;  %v2153_v46 = vpop.f32.mrb[34].mxu0 }
 0x21f   :  { %v609_v22 = vadd.f32 %v2153_v46, %v442_v30  ;;  %v600_v62 = vpop.f32.mrb[35].mxu0  ;;  %v638_v1 = vmax.f32 %v606_v40, 0.0 }
 0x220   :  { %v601_v14 = vadd.f32 %v600_v62, %v442_v30  ;;  %v636_v28 = vmax.f32 %v598_v24, 0.0  ;;  %v2393_v24 = vld [vmem:[%s3309_s4 + $0x68] sm:$0xff]   ;;  %v2394_v62 = vld [vmem:[%s3309_s4 + $0x70] sm:$0xff]  }
 0x221   :  { %v639_v18 = vmax.f32 %v609_v22, 0.0  ;;  %2200 = vmatprep.subr.bf16.mxu0 %v2393_v24 }
 0x222   :  { %v637_v44 = vmax.f32 %v601_v14, 0.0  ;;  %2201 = vmatpush3.bf16.msra.mxu0 %v2393_v24  ;;  %v2396_v14 = vld [vmem:[#allocation2 + $0x40] sm:$0xff]  }
 0x223   :  { %v649_v26 = vpack.c.bf16 %v639_v18, %v638_v1  ;;  %2202 = vmatprep.subr.bf16.mxu0 %v2394_v62  ;;  %v2397_v1 = vld [vmem:[#allocation2 + $0x48] sm:$0xff]   ;;  %2222 = vmatprep.subr.bf16.mxu1 %v2396_v14  ;;  %v2398_v18 = vld [vmem:[#allocation2 + $0x50] sm:$0xff]  }
 0x224   :  { %v648_v6 = vpack.c.bf16 %v637_v44, %v636_v28  ;;  %v2156_v9 = vpop.f32.mrb[36].mxu0  ;;  %2223 = vmatpush3.bf16.msra.mxu1 %v2396_v14  ;;  %v2399_v28 = vld [vmem:[#allocation2 + $0x58] sm:$0xff]   ;;  %v2400_v44 = vld [vmem:[#allocation2 + $0x60] sm:$0xff]  }
 0x225   :  { %v622_v16 = vadd.f32 %v2156_v9, %v442_v30  ;;  %v613_v56 = vpop.f32.mrb[37].mxu0  ;;  %2224 = vmatprep.subr.bf16.mxu1 %v2397_v1  ;;  %v2930_v9 = vld [vmem:[#allocation4] ss:$0 sm:$0xff] }
 0x226   :  { %v614_v57 = vadd.f32 %v613_v56, %v442_v30  ;;  %v2157_v48 = vpop.f32.mrb[38].mxu0  ;;  %2182 = vmatprep.mubr.bf16.mxu1 %v648_v6  ;;  %2203 = vmatpush3.bf16.msra.mxu0 %v2394_v62  ;;  %v114_v6 = vsub.s32 2, %v2730_v52 }
 0x227   :  { %v625_v43 = vadd.f32 %v2157_v48, %v442_v30  ;;  %v616_v58 = vpop.f32.mrb[39].mxu0  ;;  %2183 = vmatmul.mubr.bf16.gmra.mrb[48].mxu1 %v649_v26  ;;  %v642_v51 = vmax.f32 %v622_v16, 0.0  ;;  %v2401_v26 = vld [vmem:[#allocation2 + $0x68] sm:$0xff]  }
 0x228   :  { %v617_v45 = vadd.f32 %v616_v58, %v442_v30  ;;  %v640_v42 = vmax.f32 %v614_v57, 0.0  ;;  %v2395_v30 = vld [vmem:[%s3309_s4 + $0x78] sm:$0xff]   ;;  %2225 = vmatpush3.bf16.msra.mxu1 %v2397_v1  ;;  %v2933_v16 = vrot.slane %v2741_v54, %v114_v6 }
 0x229   :  { %v643_v37 = vmax.f32 %v625_v43, 0.0  ;;  %2204 = vmatprep.subr.bf16.mxu0 %v2395_v30  ;;  %2226 = vmatprep.subr.bf16.mxu1 %v2398_v18 }
 0x22a   :  { %v641_v46 = vmax.f32 %v617_v45, 0.0  ;;  %2205 = vmatpush3.bf16.msra.mxu0 %v2395_v30  ;;  %v350_v45 = vadd.f32 %v2853_v63, %v2933_v16  ;;  %v354_v24 = vadd.f32 %v2860_v3, %v2933_v16 }
 0x22b   :  { %v651_v40 = vpack.c.bf16 %v643_v37, %v642_v51 }
 0x22c   :  { %v650_v22 = vpack.c.bf16 %v641_v46, %v640_v42  ;;  %2227 = vmatpush3.bf16.msra.mxu1 %v2398_v18  ;;  %v340_v46 = vadd.f32 %v2836_v50, %v2933_v16 }
 0x22d   :  { %2228 = vmatprep.subr.bf16.mxu1 %v2399_v28 }
 0x22e   :  { %2186 = vmatprep.mubr.bf16.mxu1 %v650_v22 }
 0x22f   :  { %2187 = vmatmul.mubr.bf16.gmra.mrb[52].mxu1 %v651_v40 }
 0x230   :  { %2229 = vmatpush3.bf16.msra.mxu1 %v2399_v28 }
 0x231   :  { %2230 = vmatprep.subr.bf16.mxu1 %v2400_v44 }
 0x234   :  { %2231 = vmatpush3.bf16.msra.mxu1 %v2400_v44 }
 0x235   :  { %2232 = vmatprep.subr.bf16.mxu1 %v2401_v26 }
 0x238   :  { %2233 = vmatpush3.bf16.msra.mxu1 %v2401_v26 }
 0x2da   :  { %v2176_v56 = vpop.f32.mrb[40].mxu1 }
 0x2db   :  { %v766_v57 = vadd.f32 %v2176_v56, %v2930_v9  ;;  %v757_v48 = vpop.f32.mrb[41].mxu1 }
 0x2dc   :  { %v758_v43 = vadd.f32 %v2930_v9, %v757_v48  ;;  %v2177_v58 = vpop.f32.mrb[42].mxu1 }
 0x2dd   :  { %v822_v51 = vadd.f32 %v766_v57, %v2780_v31  ;;  %v769_v37 = vadd.f32 %v2177_v58, %v2930_v9  ;;  %v760_v42 = vpop.f32.mrb[43].mxu1  ;;  %v344_v31 = vadd.f32 %v2846_v60, %v2933_v16  ;;  %v370_v57 = vadd.f32 %v2875_v15, %v2933_v16 }
 0x2de   :  { %v820_v40 = vadd.f32 %v758_v43, %v2762_v8  ;;  %v761_v22 = vadd.f32 %v2930_v9, %v760_v42  ;;  %v374_v42 = vadd.f32 %v2879_v17, %v2933_v16 }
 0x2df   :  { %v2947_v62 = vadd.f32 %v822_v51, %v350_v45  ;;  %v823_v30 = vadd.f32 %v769_v37, %v2786_v35  ;;  %v360_v45 = vadd.f32 %v2867_v7, %v2933_v16 }
 0x2e0   :  { %v2952_v63 = vadd.f32 %v820_v40, %v340_v46  ;;  %v821_v14 = vadd.f32 %v761_v22, %v2768_v12 }
 0x2e1   :  { %v2955_v1 = vadd.f32 %v823_v30, %v354_v24  ;;  %v864_v28 = vmax.f32 %v2947_v62, 0.0 }
 0x2e2   :  { %v2957_v50 = vadd.f32 %v821_v14, %v344_v31  ;;  %v862_v18 = vmax.f32 %v2952_v63, 0.0 }
 0x2e3   :  { %v865_v8 = vmax.f32 %v2955_v1, 0.0 }
 0x2e4   :  { %v863_v3 = vmax.f32 %v2957_v50, 0.0 }
 0x2e5   :  { %v879_v44 = vpack.c.bf16 %v865_v8, %v864_v28  ;;  %v390_v28 = vadd.f32 %v2891_v25, %v2933_v16 }
 0x2e6   :  { %v878_v35 = vpack.c.bf16 %v863_v3, %v862_v18 }
 0x2e8   :  { %2206 = vmatprep.mubr.bf16.mxu0 %v878_v35 }
 0x2e9   :  { %2207 = vmatmul.mubr.bf16.vlgmr.msra.gmra.mrb[40].mxu0 %v879_v44 }
 0x2ea   :  { %v2180_v60 = vpop.f32.mrb[44].mxu1 }
 0x2eb   :  { %v782_v26 = vadd.f32 %v2180_v60, %v2930_v9  ;;  %v773_v12 = vpop.f32.mrb[45].mxu1 }
 0x2ec   :  { %v774_v6 = vadd.f32 %v2930_v9, %v773_v12  ;;  %v2181_v56 = vpop.f32.mrb[46].mxu1 }
 0x2ed   :  { %v826_v48 = vadd.f32 %v782_v26, %v2805_v2  ;;  %v785_v43 = vadd.f32 %v2181_v56, %v2930_v9  ;;  %v776_v58 = vpop.f32.mrb[47].mxu1  ;;  %v364_v2 = vadd.f32 %v2871_v11, %v2933_v16  ;;  %v380_v26 = vadd.f32 %v2883_v20, %v2933_v16 }
 0x2ee   :  { %v824_v51 = vadd.f32 %v774_v6, %v2795_v47  ;;  %v777_v37 = vadd.f32 %v2930_v9, %v776_v58  ;;  %v394_v56 = vadd.f32 %v2895_v27, %v2933_v16 }
 0x2ef   :  { %v2975_v46 = vadd.f32 %v826_v48, %v370_v57  ;;  %v827_v40 = vadd.f32 %v785_v43, %v2808_v4 }
 0x2f0   :  { %v2980_v15 = vadd.f32 %v824_v51, %v360_v45  ;;  %v825_v22 = vadd.f32 %v777_v37, %v2798_v49 }
 0x2f1   :  { %v2983_v24 = vadd.f32 %v827_v40, %v374_v42  ;;  %v868_v31 = vmax.f32 %v2975_v46, 0.0 }
 0x2f2   :  { %v2985_v7 = vadd.f32 %v825_v22, %v364_v2  ;;  %v866_v30 = vmax.f32 %v2980_v15, 0.0 }
 0x2f3   :  { %v869_v47 = vmax.f32 %v2983_v24, 0.0 }
 0x2f4   :  { %v867_v17 = vmax.f32 %v2985_v7, 0.0 }
 0x2f5   :  { %v881_v14 = vpack.c.bf16 %v869_v47, %v868_v31 }
 0x2f6   :  { %v880_v4 = vpack.c.bf16 %v867_v17, %v866_v30  ;;  %v400_v30 = vadd.f32 %v2899_v29, %v2933_v16 }
 0x2f8   :  { %2210 = vmatprep.mubr.bf16.mxu0 %v880_v4 }
 0x2f9   :  { %2211 = vmatmul.mubr.bf16.gmra.mrb[44].mxu0 %v881_v14  ;;  %v414_v14 = vadd.f32 %v2911_v41, %v2933_v16 }
 0x2fa   :  { %v2184_v11 = vpop.f32.mrb[48].mxu1 }
 0x2fb   :  { %v798_v8 = vadd.f32 %v2184_v11, %v2930_v9  ;;  %v789_v49 = vpop.f32.mrb[49].mxu1 }
 0x2fc   :  { %v790_v18 = vadd.f32 %v2930_v9, %v789_v49  ;;  %v2185_v3 = vpop.f32.mrb[50].mxu1 }
 0x2fd   :  { %v830_v35 = vadd.f32 %v798_v8, %v2825_v34  ;;  %v801_v44 = vadd.f32 %v2185_v3, %v2930_v9  ;;  %v792_v60 = vpop.f32.mrb[51].mxu1  ;;  %v384_v34 = vadd.f32 %v2887_v23, %v2933_v16  ;;  %v404_v8 = vadd.f32 %v2903_v32, %v2933_v16 }
 0x2fe   :  { %v828_v12 = vadd.f32 %v790_v18, %v2815_v19  ;;  %v793_v6 = vadd.f32 %v2930_v9, %v792_v60  ;;  %v2406_v60 = vld [vmem:[%s3309_s4 + $0x90] sm:$0xff]  }
 0x2ff   :  { %v3003_v57 = vadd.f32 %v830_v35, %v390_v28  ;;  %v831_v48 = vadd.f32 %v801_v44, %v2828_v38  ;;  %v2404_v35 = vld [vmem:[%s3309_s4 + $0x80] sm:$0xff]   ;;  %v2405_v44 = vld [vmem:[%s3309_s4 + $0x88] sm:$0xff]  }
 0x300   :  { %v3008_v25 = vadd.f32 %v828_v12, %v380_v26  ;;  %v829_v43 = vadd.f32 %v793_v6, %v2818_v21  ;;  %v410_v21 = vadd.f32 %v2907_v39, %v2933_v16  ;;  %v2402_v16 = vld [vmem:[#allocation2 + $0x70] sm:$0xff]   ;;  %2254 = vmatprep.subr.bf16.mxu0 %v2404_v35  ;;  %v2407_v26 = vld [vmem:[%s3309_s4 + $0x98] sm:$0xff]   ;;  %v2408_v12 = vld [vmem:[%s3309_s4 + $0xa0] sm:$0xff]  }
 0x301   :  { %v3011_v58 = vadd.f32 %v831_v48, %v394_v56  ;;  %v872_v47 = vmax.f32 %v3003_v57, 0.0  ;;  %2234 = vmatprep.subr.bf16.mxu1 %v2402_v16  ;;  %2255 = vmatpush3.bf16.msra.mxu0 %v2404_v35  ;;  %v1937_v6 = vld [vmem:[%s3306_s1 + $0x2] sm:$0x3] }
 0x302   :  { %v3013_v20 = vadd.f32 %v829_v43, %v384_v34  ;;  %v2188_v19 = vpop.f32.mrb[52].mxu1  ;;  %v870_v42 = vmax.f32 %v3008_v25, 0.0  ;;  %2235 = vmatpush3.bf16.msra.mxu1 %v2402_v16  ;;  %2256 = vmatprep.subr.bf16.mxu0 %v2405_v44  ;;  %v857_v56 = vrot.slane %v1937_v6, %v2736_v53 }
 0x303   :  { %v814_v45 = vadd.f32 %v2188_v19, %v2930_v9  ;;  %v805_v51 = vpop.f32.mrb[53].mxu1  ;;  %v873_v27 = vmax.f32 %v3011_v58, 0.0 }
 0x304   :  { %v806_v37 = vadd.f32 %v2930_v9, %v805_v51  ;;  %v2189_v38 = vpop.f32.mrb[54].mxu1  ;;  %v871_v23 = vmax.f32 %v3013_v20, 0.0 }
 0x305   :  { %v834_v40 = vadd.f32 %v814_v45, %v2783_v33  ;;  %v817_v2 = vadd.f32 %v2189_v38, %v2930_v9  ;;  %v808_v22 = vpop.f32.mrb[55].mxu1  ;;  %v883_v39 = vpack.c.bf16 %v873_v27, %v872_v47  ;;  %2257 = vmatpush3.bf16.msra.mxu0 %v2405_v44 }
 0x306   :  { %v832_v17 = vadd.f32 %v806_v37, %v2765_v10  ;;  %v809_v31 = vadd.f32 %v2930_v9, %v808_v22  ;;  %v882_v4 = vpack.c.bf16 %v871_v23, %v870_v42  ;;  %2258 = vmatprep.subr.bf16.mxu0 %v2406_v60 }
 0x307   :  { %v3031_v11 = vadd.f32 %v834_v40, %v410_v21  ;;  %v835_v33 = vadd.f32 %v817_v2, %v2788_v36 }
 0x308   :  { %v3036_v49 = vadd.f32 %v832_v17, %v400_v30  ;;  %v833_v29 = vadd.f32 %v809_v31, %v2770_v13  ;;  %2214 = vmatprep.mubr.bf16.mxu0 %v882_v4  ;;  %v2403_v13 = vld [vmem:[#allocation2 + $0x78] sm:$0xff]  }
 0x309   :  { %v3039_v10 = vadd.f32 %v835_v33, %v414_v14  ;;  %2215 = vmatmul.mubr.bf16.gmra.mrb[48].mxu0 %v883_v39  ;;  %v876_v3 = vmax.f32 %v3031_v11, 0.0  ;;  %2236 = vmatprep.subr.bf16.mxu1 %v2403_v13 }
 0x30a   :  { %v3041_v9 = vadd.f32 %v833_v29, %v404_v8  ;;  %v874_v18 = vmax.f32 %v3036_v49, 0.0  ;;  %2237 = vmatpush3.bf16.msra.mxu1 %v2403_v13  ;;  %2259 = vmatpush3.bf16.msra.mxu0 %v2406_v60 }
 0x30b   :  { %v877_v41 = vmax.f32 %v3039_v10, 0.0  ;;  %2260 = vmatprep.subr.bf16.mxu0 %v2407_v26 }
 0x30c   :  { %v875_v36 = vmax.f32 %v3041_v9, 0.0 }
 0x30d   :  { %v885_v32 = vpack.c.bf16 %v877_v41, %v876_v3  ;;  %v861_v3 = vrot.slane %v1937_v6, %v2744_v55 }
 0x30e   :  { %v884_v28 = vpack.c.bf16 %v875_v36, %v874_v18  ;;  %2261 = vmatpush3.bf16.msra.mxu0 %v2407_v26 }
 0x30f   :  { %2262 = vmatprep.subr.bf16.mxu0 %v2408_v12 }
 0x310   :  { %2218 = vmatprep.mubr.bf16.mxu0 %v884_v28 }
 0x311   :  { %2219 = vmatmul.mubr.bf16.gmra.mrb[52].mxu0 %v885_v32 }
 0x312   :  { %2263 = vmatpush3.bf16.msra.mxu0 %v2408_v12 }
 0x3bc   :  { %v2208_v48 = vpop.f32.mrb[40].mxu0 }
 0x3bd   :  { %v994_v34 = vadd.f32 %v2208_v48, %v857_v56  ;;  %v985_v43 = vpop.f32.mrb[41].mxu0 }
 0x3be   :  { %v986_v19 = vadd.f32 %v985_v43, %v857_v56  ;;  %v2209_v45 = vpop.f32.mrb[42].mxu0 }
 0x3bf   :  { %v997_v51 = vadd.f32 %v2209_v45, %v857_v56  ;;  %v988_v27 = vpop.f32.mrb[43].mxu0  ;;  %v1050_v38 = vmax.f32 %v994_v34, 0.0 }
 0x3c0   :  { %v989_v37 = vadd.f32 %v988_v27, %v857_v56  ;;  %v1048_v23 = vmax.f32 %v986_v19, 0.0 }
 0x3c1   :  { %v1051_v42 = vmax.f32 %v997_v51, 0.0 }
 0x3c2   :  { %v1049_v21 = vmax.f32 %v989_v37, 0.0 }
 0x3c3   :  { %v1065_v40 = vpack.c.bf16 %v1051_v42, %v1050_v38 }
 0x3c4   :  { %v1064_v2 = vpack.c.bf16 %v1049_v21, %v1048_v23 }
 0x3c6   :  { %2238 = vmatprep.mubr.bf16.mxu1 %v1064_v2 }
 0x3c7   :  { %2239 = vmatmul.mubr.bf16.vlgmr.msra.gmra.mrb[56].mxu1 %v1065_v40 }
 0x3cc   :  { %v2212_v22 = vpop.f32.mrb[44].mxu0 }
 0x3cd   :  { %v1010_v47 = vadd.f32 %v2212_v22, %v857_v56  ;;  %v1001_v30 = vpop.f32.mrb[45].mxu0 }
 0x3ce   :  { %v1002_v17 = vadd.f32 %v1001_v30, %v857_v56  ;;  %v2213_v31 = vpop.f32.mrb[46].mxu0 }
 0x3cf   :  { %v1013_v4 = vadd.f32 %v2213_v31, %v857_v56  ;;  %v1004_v14 = vpop.f32.mrb[47].mxu0  ;;  %v1054_v39 = vmax.f32 %v1010_v47, 0.0  ;;  %v2410_v31 = vld [vmem:[%s3309_s4 + $0xb0] sm:$0xff]  }
 0x3d0   :  { %v1005_v33 = vadd.f32 %v1004_v14, %v857_v56  ;;  %v1052_v29 = vmax.f32 %v1002_v17, 0.0  ;;  %v2409_v17 = vld [vmem:[%s3309_s4 + $0xa8] sm:$0xff]   ;;  %v2412_v14 = vld [vmem:[#allocation2 + $0x80] sm:$0xff]  }
 0x3d1   :  { %v1055_v8 = vmax.f32 %v1013_v4, 0.0  ;;  %2264 = vmatprep.subr.bf16.mxu0 %v2409_v17  ;;  %v2411_v4 = vld [vmem:[%s3309_s4 + $0xb8] sm:$0xff]   ;;  %2286 = vmatprep.subr.bf16.mxu1 %v2412_v14 }
 0x3d2   :  { %v1053_v41 = vmax.f32 %v1005_v33, 0.0  ;;  %2265 = vmatpush3.bf16.msra.mxu0 %v2409_v17  ;;  %v2413_v33 = vld [vmem:[#allocation2 + $0x88] sm:$0xff]   ;;  %2287 = vmatpush3.bf16.msra.mxu1 %v2412_v14 }
 0x3d3   :  { %v1067_v18 = vpack.c.bf16 %v1055_v8, %v1054_v39  ;;  %2266 = vmatprep.subr.bf16.mxu0 %v2410_v31  ;;  %2288 = vmatprep.subr.bf16.mxu1 %v2413_v33  ;;  %v2414_v39 = vld [vmem:[#allocation2 + $0x90] sm:$0xff]   ;;  %v2415_v8 = vld [vmem:[#allocation2 + $0x98] sm:$0xff]  }
 0x3d4   :  { %v1066_v36 = vpack.c.bf16 %v1053_v41, %v1052_v29  ;;  %v2416_v29 = vld [vmem:[#allocation2 + $0xa0] sm:$0xff]   ;;  %v2417_v41 = vld [vmem:[#allocation2 + $0xa8] sm:$0xff]  }
 0x3d6   :  { %2242 = vmatprep.mubr.bf16.mxu1 %v1066_v36  ;;  %2267 = vmatpush3.bf16.msra.mxu0 %v2410_v31  ;;  %v3077_v36 = vld [vmem:[#allocation4 + $0x1] ss:$0 sm:$0xff] }
 0x3d7   :  { %2243 = vmatmul.mubr.bf16.gmra.mrb[60].mxu1 %v1067_v18  ;;  %2268 = vmatprep.subr.bf16.mxu0 %v2411_v4  ;;  %v118_v18 = vsub.s32 3, %v2730_v52 }
 0x3d8   :  { %2289 = vmatpush3.bf16.msra.mxu1 %v2413_v33 }
 0x3d9   :  { %2290 = vmatprep.subr.bf16.mxu1 %v2414_v39 }
 0x3da   :  { %2269 = vmatpush3.bf16.msra.mxu0 %v2411_v4  ;;  %v3329_v4 = vld [vmem:[#allocation12_spill] sm:$0xff] }
 0x3dc   :  { %v2216_v28 = vpop.f32.mrb[48].mxu0  ;;  %2291 = vmatpush3.bf16.msra.mxu1 %v2414_v39 }
 0x3dd   :  { %v1026_v32 = vadd.f32 %v2216_v28, %v861_v3  ;;  %v1017_v16 = vpop.f32.mrb[49].mxu0  ;;  %2292 = vmatprep.subr.bf16.mxu1 %v2415_v8 }
 0x3de   :  { %v1018_v13 = vadd.f32 %v1017_v16, %v861_v3  ;;  %v2217_v35 = vpop.f32.mrb[50].mxu0 }
 0x3df   :  { %v1029_v44 = vadd.f32 %v2217_v35, %v861_v3  ;;  %v1020_v60 = vpop.f32.mrb[51].mxu0  ;;  %v1058_v12 = vmax.f32 %v1026_v32, 0.0 }
 0x3e0   :  { %v1021_v26 = vadd.f32 %v1020_v60, %v861_v3  ;;  %v1056_v48 = vmax.f32 %v1018_v13, 0.0  ;;  %2293 = vmatpush3.bf16.msra.mxu1 %v2415_v8  ;;  %v3330_v8 = vld [vmem:[#allocation10_spill] sm:$0xff] }
 0x3e1   :  { %v1059_v56 = vmax.f32 %v1029_v44, 0.0  ;;  %2294 = vmatprep.subr.bf16.mxu1 %v2416_v29 }
 0x3e2   :  { %v1057_v34 = vmax.f32 %v1021_v26, 0.0 }
 0x3e3   :  { %v1069_v43 = vpack.c.bf16 %v1059_v56, %v1058_v12 }
 0x3e4   :  { %v1068_v19 = vpack.c.bf16 %v1057_v34, %v1056_v48  ;;  %v2220_v45 = vpop.f32.mrb[52].mxu0  ;;  %2295 = vmatpush3.bf16.msra.mxu1 %v2416_v29 }
 0x3e5   :  { %v1042_v51 = vadd.f32 %v2220_v45, %v861_v3  ;;  %v1033_v27 = vpop.f32.mrb[53].mxu0  ;;  %2296 = vmatprep.subr.bf16.mxu1 %v2417_v41 }
 0x3e6   :  { %v1034_v37 = vadd.f32 %v1033_v27, %v861_v3  ;;  %v2221_v38 = vpop.f32.mrb[54].mxu0  ;;  %2246 = vmatprep.mubr.bf16.mxu1 %v1068_v19 }
 0x3e7   :  { %v1045_v6 = vadd.f32 %v2221_v38, %v861_v3  ;;  %v1036_v42 = vpop.f32.mrb[55].mxu0  ;;  %2247 = vmatmul.mubr.bf16.gmra.mrb[64].mxu1 %v1069_v43  ;;  %v1062_v21 = vmax.f32 %v1042_v51, 0.0 }
 0x3e8   :  { %v1037_v23 = vadd.f32 %v1036_v42, %v861_v3  ;;  %v1060_v2 = vmax.f32 %v1034_v37, 0.0  ;;  %2297 = vmatpush3.bf16.msra.mxu1 %v2417_v41  ;;  %v3080_v3 = vrot.slane %v2741_v54, %v118_v18 }
 0x3e9   :  { %v1063_v40 = vmax.f32 %v1045_v6, 0.0 }
 0x3ea   :  { %v1061_v22 = vmax.f32 %v1037_v23, 0.0  ;;  %v352_v44 = vadd.f32 %v2855_v0, %v3080_v3  ;;  %v342_v12 = vadd.f32 %v2844_v59, %v3080_v3  ;;  %v356_v48 = vadd.f32 %v2862_v5, %v3080_v3  ;;  %v3327_v23 = vld [vmem:[#allocation11_spill] sm:$0xff] }
 0x3eb   :  { %v1071_v47 = vpack.c.bf16 %v1063_v40, %v1062_v21  ;;  %v346_v0 = vadd.f32 %v2848_v61, %v3080_v3  ;;  %v372_v21 = vadd.f32 %v3327_v23, %v3080_v3  ;;  %v376_v14 = vadd.f32 %v3329_v4, %v3080_v3 }
 0x3ec   :  { %v1070_v30 = vpack.c.bf16 %v1061_v22, %v1060_v2 }
 0x3ee   :  { %2250 = vmatprep.mubr.bf16.mxu1 %v1070_v30 }
 0x3ef   :  { %2251 = vmatmul.mubr.bf16.gmra.mrb[68].mxu1 %v1071_v47  ;;  %v3328_v47 = vld [vmem:[#allocation9_spill] sm:$0xff] }
 0x3f0   :  { %v362_v30 = vadd.f32 %v3328_v47, %v3080_v3 }
 0x49a   :  { %v2240_v28 = vpop.f32.mrb[56].mxu1 }
 0x49b   :  { %v1188_v32 = vadd.f32 %v2240_v28, %v3077_v36  ;;  %v1179_v16 = vpop.f32.mrb[57].mxu1 }
 0x49c   :  { %v1180_v13 = vadd.f32 %v3077_v36, %v1179_v16  ;;  %v2241_v35 = vpop.f32.mrb[58].mxu1 }
 0x49d   :  { %v1244_v60 = vadd.f32 %v1188_v32, %v2947_v62  ;;  %v1191_v26 = vadd.f32 %v2241_v35, %v3077_v36  ;;  %v1182_v52 = vpop.f32.mrb[59].mxu1 }
 0x49e   :  { %v1242_v54 = vadd.f32 %v1180_v13, %v2952_v63  ;;  %v1183_v56 = vadd.f32 %v3077_v36, %v1182_v52 }
 0x49f   :  { %v3094_v34 = vadd.f32 %v1244_v60, %v352_v44  ;;  %v1245_v43 = vadd.f32 %v1191_v26, %v2955_v1 }
 0x4a0   :  { %v3099_v62 = vadd.f32 %v1242_v54, %v342_v12  ;;  %v1243_v19 = vadd.f32 %v1183_v56, %v2957_v50  ;;  %v3331_v12 = vld [vmem:[#allocation15_spill] sm:$0xff] }
 0x4a1   :  { %v3102_v45 = vadd.f32 %v1245_v43, %v356_v48  ;;  %v1286_v27 = vmax.f32 %v3094_v34, 0.0  ;;  %v392_v54 = vadd.f32 %v3331_v12, %v3080_v3 }
 0x4a2   :  { %v3104_v59 = vadd.f32 %v1243_v19, %v346_v0  ;;  %v1284_v51 = vmax.f32 %v3099_v62, 0.0  ;;  %v3332_v0 = vld [vmem:[#allocation13_spill] sm:$0xff] }
 0x4a3   :  { %v1287_v63 = vmax.f32 %v3102_v45, 0.0  ;;  %v382_v19 = vadd.f32 %v3332_v0, %v3080_v3  ;;  %v2422_v0 = vld [vmem:[%s3312_s7 + $0x10] sm:$0xff]  }
 0x4a4   :  { %v1285_v5 = vmax.f32 %v3104_v59, 0.0 }
 0x4a5   :  { %v1301_v37 = vpack.c.bf16 %v1287_v63, %v1286_v27 }
 0x4a6   :  { %v1300_v1 = vpack.c.bf16 %v1285_v5, %v1284_v51  ;;  %v3333_v5 = vld [vmem:[#allocation16_spill] sm:$0xff] }
 0x4a7   :  { %v396_v27 = vadd.f32 %v3333_v5, %v3080_v3 }
 0x4a8   :  { %2270 = vmatprep.mubr.bf16.mxu0 %v1300_v1 }
 0x4a9   :  { %2271 = vmatmul.mubr.bf16.vlgmr.msra.gmra.mrb[56].mxu0 %v1301_v37 }
 0x4aa   :  { %v2244_v61 = vpop.f32.mrb[60].mxu1 }
 0x4ab   :  { %v1204_v38 = vadd.f32 %v2244_v61, %v3077_v36  ;;  %v1195_v50 = vpop.f32.mrb[61].mxu1  ;;  %v3334_v61 = vld [vmem:[#allocation14_spill] sm:$0xff] }
 0x4ac   :  { %v1196_v6 = vadd.f32 %v3077_v36, %v1195_v50  ;;  %v2245_v42 = vpop.f32.mrb[62].mxu1 }
 0x4ad   :  { %v1248_v40 = vadd.f32 %v1204_v38, %v2975_v46  ;;  %v1207_v2 = vadd.f32 %v2245_v42, %v3077_v36  ;;  %v1198_v22 = vpop.f32.mrb[63].mxu1  ;;  %v366_v46 = vadd.f32 %v3330_v8, %v3080_v3 }
 0x4ae   :  { %v1246_v17 = vadd.f32 %v1196_v6, %v2980_v15  ;;  %v1199_v31 = vadd.f32 %v3077_v36, %v1198_v22 }
 0x4af   :  { %v3122_v33 = vadd.f32 %v1248_v40, %v372_v21  ;;  %v1249_v39 = vadd.f32 %v1207_v2, %v2983_v24 }
 0x4b0   :  { %v3127_v29 = vadd.f32 %v1246_v17, %v362_v30  ;;  %v1247_v41 = vadd.f32 %v1199_v31, %v2985_v7  ;;  %v3335_v30 = vld [vmem:[#allocation19_spill] sm:$0xff] }
 0x4b1   :  { %v3130_v18 = vadd.f32 %v1249_v39, %v376_v14  ;;  %v1290_v13 = vmax.f32 %v3122_v33, 0.0  ;;  %v3336_v39 = vld [vmem:[#allocation17_spill] sm:$0xff] }
 0x4b2   :  { %v3132_v28 = vadd.f32 %v1247_v41, %v366_v46  ;;  %v1288_v32 = vmax.f32 %v3127_v29, 0.0  ;;  %v402_v8 = vadd.f32 %v3336_v39, %v3080_v3 }
 0x4b3   :  { %v1291_v15 = vmax.f32 %v3130_v18, 0.0 }
 0x4b4   :  { %v1289_v16 = vmax.f32 %v3132_v28, 0.0 }
 0x4b5   :  { %v1303_v35 = vpack.c.bf16 %v1291_v15, %v1290_v13 }
 0x4b6   :  { %v1302_v24 = vpack.c.bf16 %v1289_v16, %v1288_v32  ;;  %v3337_v32 = vld [vmem:[#allocation20_spill] sm:$0xff] }
 0x4b7   :  { %v416_v16 = vadd.f32 %v3337_v32, %v3080_v3 }
 0x4b8   :  { %2274 = vmatprep.mubr.bf16.mxu0 %v1302_v24 }
 0x4b9   :  { %2275 = vmatmul.mubr.bf16.gmra.mrb[60].mxu0 %v1303_v35  ;;  %v3338_v35 = vld [vmem:[#allocation18_spill] sm:$0xff] }
 0x4ba   :  { %v2248_v44 = vpop.f32.mrb[64].mxu1 }
 0x4bb   :  { %v1220_v60 = vadd.f32 %v2248_v44, %v3077_v36  ;;  %v1211_v7 = vpop.f32.mrb[65].mxu1  ;;  %v406_v44 = vadd.f32 %v3338_v35, %v3080_v3 }
 0x4bc   :  { %v1212_v26 = vadd.f32 %v3077_v36, %v1211_v7  ;;  %v2249_v52 = vpop.f32.mrb[66].mxu1 }
 0x4bd   :  { %v1252_v56 = vadd.f32 %v1220_v60, %v3003_v57  ;;  %v1223_v48 = vadd.f32 %v2249_v52, %v3077_v36  ;;  %v1214_v43 = vpop.f32.mrb[67].mxu1  ;;  %v386_v57 = vadd.f32 %v3334_v61, %v3080_v3 }
 0x4be   :  { %v1250_v63 = vadd.f32 %v1212_v26, %v3008_v25  ;;  %v1215_v51 = vadd.f32 %v3077_v36, %v1214_v43  ;;  %v2421_v43 = vld [vmem:[%s3312_s7 + $0x8] sm:$0xff]  }
 0x4bf   :  { %v3150_v1 = vadd.f32 %v1252_v56, %v392_v54  ;;  %v1253_v37 = vadd.f32 %v1223_v48, %v3011_v58  ;;  %v2418_v56 = vld [vmem:[#allocation2 + $0xb0] sm:$0xff]   ;;  %v2420_v48 = vld [vmem:[%s3312_s7] sm:$0xff]  }
 0x4c0   :  { %v3155_v38 = vadd.f32 %v1250_v63, %v382_v19  ;;  %v1251_v50 = vadd.f32 %v1215_v51, %v3013_v20  ;;  %v412_v20 = vadd.f32 %v3335_v30, %v3080_v3  ;;  %2298 = vmatprep.subr.bf16.mxu1 %v2418_v56  ;;  %2318 = vmatprep.subr.bf16.mxu0 %v2420_v48  ;;  %v2423_v19 = vld [vmem:[%s3312_s7 + $0x18] sm:$0xff]   ;;  %v2424_v63 = vld [vmem:[%s3312_s7 + $0x20] sm:$0xff]  }
 0x4c1   :  { %v3158_v6 = vadd.f32 %v1253_v37, %v396_v27  ;;  %v1294_v14 = vmax.f32 %v3150_v1, 0.0  ;;  %2299 = vmatpush3.bf16.msra.mxu1 %v2418_v56  ;;  %2319 = vmatpush3.bf16.msra.mxu0 %v2420_v48  ;;  %v1971_v51 = vld [vmem:[%s3306_s1 + $0x4] sm:$0x3] }
 0x4c2   :  { %v3160_v42 = vadd.f32 %v1251_v50, %v386_v57  ;;  %v2252_v25 = vpop.f32.mrb[68].mxu1  ;;  %v1292_v22 = vmax.f32 %v3155_v38, 0.0  ;;  %2320 = vmatprep.subr.bf16.mxu0 %v2421_v43  ;;  %v1279_v5 = vrot.slane %v1971_v51, %v2736_v53 }
 0x4c3   :  { %v1236_v23 = vadd.f32 %v2252_v25, %v3077_v36  ;;  %v1227_v21 = vpop.f32.mrb[69].mxu1  ;;  %v1295_v40 = vmax.f32 %v3158_v6, 0.0 }
 0x4c4   :  { %v1228_v2 = vadd.f32 %v3077_v36, %v1227_v21  ;;  %v2253_v58 = vpop.f32.mrb[70].mxu1  ;;  %v1293_v47 = vmax.f32 %v3160_v42, 0.0 }
 0x4c5   :  { %v1256_v17 = vadd.f32 %v1236_v23, %v3031_v11  ;;  %v1239_v31 = vadd.f32 %v2253_v58, %v3077_v36  ;;  %v1230_v4 = vpop.f32.mrb[71].mxu1  ;;  %v1305_v24 = vpack.c.bf16 %v1295_v40, %v1294_v14  ;;  %2321 = vmatpush3.bf16.msra.mxu0 %v2421_v43 }
 0x4c6   :  { %v1254_v46 = vadd.f32 %v1228_v2, %v3036_v49  ;;  %v1231_v41 = vadd.f32 %v3077_v36, %v1230_v4  ;;  %v1304_v15 = vpack.c.bf16 %v1293_v47, %v1292_v22  ;;  %2322 = vmatprep.subr.bf16.mxu0 %v2422_v0 }
 0x4c7   :  { %v3178_v13 = vadd.f32 %v1256_v17, %v412_v20  ;;  %v1257_v11 = vadd.f32 %v1239_v31, %v3039_v10 }
 0x4c8   :  { %v3183_v60 = vadd.f32 %v1254_v46, %v402_v8  ;;  %v1255_v7 = vadd.f32 %v1231_v41, %v3041_v9  ;;  %2278 = vmatprep.mubr.bf16.mxu0 %v1304_v15  ;;  %v2419_v9 = vld [vmem:[#allocation2 + $0xb8] sm:$0xff]  }
 0x4c9   :  { %v3186_v49 = vadd.f32 %v1257_v11, %v416_v16  ;;  %2279 = vmatmul.mubr.bf16.gmra.mrb[64].mxu0 %v1305_v24  ;;  %v1298_v12 = vmax.f32 %v3178_v13, 0.0  ;;  %2300 = vmatprep.subr.bf16.mxu1 %v2419_v9  ;;  %v1283_v24 = vrot.slane %v1971_v51, %v2744_v55 }
 0x4ca   :  { %v3188_v36 = vadd.f32 %v1255_v7, %v406_v44  ;;  %v1296_v52 = vmax.f32 %v3183_v60, 0.0  ;;  %2301 = vmatpush3.bf16.msra.mxu1 %v2419_v9  ;;  %2323 = vmatpush3.bf16.msra.mxu0 %v2422_v0 }
 0x4cb   :  { %v1299_v26 = vmax.f32 %v3186_v49, 0.0  ;;  %2324 = vmatprep.subr.bf16.mxu0 %v2423_v19 }
 0x4cc   :  { %v1297_v10 = vmax.f32 %v3188_v36, 0.0 }
 0x4cd   :  { %v1307_v3 = vpack.c.bf16 %v1299_v26, %v1298_v12 }
 0x4ce   :  { %v1306_v54 = vpack.c.bf16 %v1297_v10, %v1296_v52  ;;  %2325 = vmatpush3.bf16.msra.mxu0 %v2423_v19 }
 0x4cf   :  { %2326 = vmatprep.subr.bf16.mxu0 %v2424_v63 }
 0x4d0   :  { %2282 = vmatprep.mubr.bf16.mxu0 %v1306_v54 }
 0x4d1   :  { %2283 = vmatmul.mubr.bf16.gmra.mrb[68].mxu0 %v1307_v3 }
 0x4d2   :  { %2327 = vmatpush3.bf16.msra.mxu0 %v2424_v63 }
 0x57c   :  { %v2272_v27 = vpop.f32.mrb[56].mxu0 }
 0x57d   :  { %v1416_v37 = vadd.f32 %v2272_v27, %v1279_v5  ;;  %v1407_v61 = vpop.f32.mrb[57].mxu0 }
 0x57e   :  { %v1408_v57 = vadd.f32 %v1407_v61, %v1279_v5  ;;  %v2273_v50 = vpop.f32.mrb[58].mxu0 }
 0x57f   :  { %v1419_v25 = vadd.f32 %v2273_v50, %v1279_v5  ;;  %v1410_v23 = vpop.f32.mrb[59].mxu0  ;;  %v1472_v40 = vmax.f32 %v1416_v37, 0.0 }
 0x580   :  { %v1411_v21 = vadd.f32 %v1410_v23, %v1279_v5  ;;  %v1470_v58 = vmax.f32 %v1408_v57, 0.0 }
 0x581   :  { %v1473_v2 = vmax.f32 %v1419_v25, 0.0 }
 0x582   :  { %v1471_v22 = vmax.f32 %v1411_v21, 0.0 }
 0x583   :  { %v1487_v47 = vpack.c.bf16 %v1473_v2, %v1472_v40  ;;  %v2425_v2 = vld [vmem:[%s3312_s7 + $0x28] sm:$0xff]  }
 0x584   :  { %v1486_v30 = vpack.c.bf16 %v1471_v22, %v1470_v58  ;;  %2328 = vmatprep.subr.bf16.mxu0 %v2425_v2  ;;  %v2426_v58 = vld [vmem:[%s3312_s7 + $0x30] sm:$0xff]   ;;  %v2427_v22 = vld [vmem:[%s3312_s7 + $0x38] sm:$0xff]  }
 0x585   :  { %2329 = vmatpush3.bf16.msra.mxu0 %v2425_v2 }
 0x586   :  { %2302 = vmatprep.mubr.bf16.mxu1 %v1486_v30  ;;  %2330 = vmatprep.subr.bf16.mxu0 %v2426_v58 }
 0x587   :  { %2303 = vmatmul.mubr.bf16.vlgmr.msra.gmra.mrb[72].mxu1 %v1487_v47  ;;  %v3223_v47 = vld [vmem:[#allocation4 + $0x2] ss:$0 sm:$0xff] }
 0x589   :  { %2331 = vmatpush3.bf16.msra.mxu0 %v2426_v58 }
 0x58a   :  { %2332 = vmatprep.subr.bf16.mxu0 %v2427_v22 }
 0x58c   :  { %v2276_v20 = vpop.f32.mrb[60].mxu0 }
 0x58d   :  { %v1432_v17 = vadd.f32 %v2276_v20, %v1279_v5  ;;  %v1423_v31 = vpop.f32.mrb[61].mxu0  ;;  %2333 = vmatpush3.bf16.msra.mxu0 %v2427_v22 }
 0x58e   :  { %v1424_v53 = vadd.f32 %v1423_v31, %v1279_v5  ;;  %v2277_v4 = vpop.f32.mrb[62].mxu0 }
 0x58f   :  { %v1435_v14 = vadd.f32 %v2277_v4, %v1279_v5  ;;  %v1426_v39 = vpop.f32.mrb[63].mxu0  ;;  %v1476_v46 = vmax.f32 %v1432_v17, 0.0 }
 0x590   :  { %v1427_v8 = vadd.f32 %v1426_v39, %v1279_v5  ;;  %v1474_v15 = vmax.f32 %v1424_v53, 0.0 }
 0x591   :  { %v1477_v41 = vmax.f32 %v1435_v14, 0.0 }
 0x592   :  { %v1475_v32 = vmax.f32 %v1427_v8, 0.0 }
 0x593   :  { %v1489_v16 = vpack.c.bf16 %v1477_v41, %v1476_v46 }
 0x594   :  { %v1488_v11 = vpack.c.bf16 %v1475_v32, %v1474_v15 }
 0x596   :  { %2306 = vmatprep.mubr.bf16.mxu1 %v1488_v11 }
 0x597   :  { %2307 = vmatmul.mubr.bf16.gmra.mrb[76].mxu1 %v1489_v16 }
 0x59c   :  { %v2280_v35 = vpop.f32.mrb[64].mxu0 }
 0x59d   :  { %v1448_v44 = vadd.f32 %v2280_v35, %v1283_v24  ;;  %v1439_v7 = vpop.f32.mrb[65].mxu0 }
 0x59e   :  { %v1440_v26 = vadd.f32 %v1439_v7, %v1283_v24  ;;  %v2281_v52 = vpop.f32.mrb[66].mxu0 }
 0x59f   :  { %v1451_v10 = vadd.f32 %v2281_v52, %v1283_v24  ;;  %v1442_v12 = vpop.f32.mrb[67].mxu0  ;;  %v1480_v3 = vmax.f32 %v1448_v44, 0.0 }
 0x5a0   :  { %v1443_v54 = vadd.f32 %v1442_v12, %v1283_v24  ;;  %v1478_v9 = vmax.f32 %v1440_v26, 0.0 }
 0x5a1   :  { %v1481_v56 = vmax.f32 %v1451_v10, 0.0 }
 0x5a2   :  { %v1479_v48 = vmax.f32 %v1443_v54, 0.0 }
 0x5a3   :  { %v1491_v43 = vpack.c.bf16 %v1481_v56, %v1480_v3 }
 0x5a4   :  { %v1490_v0 = vpack.c.bf16 %v1479_v48, %v1478_v9  ;;  %v2284_v19 = vpop.f32.mrb[68].mxu0 }
 0x5a5   :  { %v1464_v63 = vadd.f32 %v2284_v19, %v1283_v24  ;;  %v1455_v5 = vpop.f32.mrb[69].mxu0 }
 0x5a6   :  { %v1456_v27 = vadd.f32 %v1455_v5, %v1283_v24  ;;  %v2285_v37 = vpop.f32.mrb[70].mxu0  ;;  %2310 = vmatprep.mubr.bf16.mxu1 %v1490_v0 }
 0x5a7   :  { %v1467_v55 = vadd.f32 %v2285_v37, %v1283_v24  ;;  %v1458_v51 = vpop.f32.mrb[71].mxu0  ;;  %2311 = vmatmul.mubr.bf16.gmra.mrb[80].mxu1 %v1491_v43  ;;  %v1484_v57 = vmax.f32 %v1464_v63, 0.0 }
 0x5a8   :  { %v1459_v61 = vadd.f32 %v1458_v51, %v1283_v24  ;;  %v1482_v25 = vmax.f32 %v1456_v27, 0.0 }
 0x5a9   :  { %v1485_v50 = vmax.f32 %v1467_v55, 0.0 }
 0x5aa   :  { %v1483_v23 = vmax.f32 %v1459_v61, 0.0 }
 0x5ab   :  { %v1493_v21 = vpack.c.bf16 %v1485_v50, %v1484_v57 }
 0x5ac   :  { %v1492_v40 = vpack.c.bf16 %v1483_v23, %v1482_v25 }
 0x5ae   :  { %2314 = vmatprep.mubr.bf16.mxu1 %v1492_v40 }
 0x5af   :  { %2315 = vmatmul.mubr.bf16.gmra.mrb[84].mxu1 %v1493_v21 }
 0x65a   :  { %v2304_v30 = vpop.f32.mrb[72].mxu1 }
 0x65b   :  { %v1610_v20 = vadd.f32 %v2304_v30, %v3223_v47  ;;  %v1601_v17 = vpop.f32.mrb[73].mxu1 }
 0x65c   :  { %v1602_v31 = vadd.f32 %v3223_v47, %v1601_v17  ;;  %v2305_v53 = vpop.f32.mrb[74].mxu1 }
 0x65d   :  { %v1666_v4 = vadd.f32 %v1610_v20, %v3094_v34  ;;  %v1613_v14 = vadd.f32 %v2305_v53, %v3223_v47  ;;  %v1604_v39 = vpop.f32.mrb[75].mxu1 }
 0x65e   :  { %v1664_v8 = vadd.f32 %v1602_v31, %v3099_v62  ;;  %v1605_v46 = vadd.f32 %v3223_v47, %v1604_v39 }
 0x65f   :  { %v1667_v41 = vadd.f32 %v1613_v14, %v3102_v45  ;;  %v1682_v32 = vmax.f32 %v1666_v4, 0.0 }
 0x660   :  { %v1665_v15 = vadd.f32 %v1605_v46, %v3104_v59  ;;  %v1680_v11 = vmax.f32 %v1664_v8, 0.0 }
 0x661   :  { %v1683_v16 = vmax.f32 %v1667_v41, 0.0 }
 0x662   :  { %v1681_v24 = vmax.f32 %v1665_v15, 0.0 }
 0x663   :  { %v1697_v35 = vpack.c.bf16 %v1683_v16, %v1682_v32 }
 0x664   :  { %v1696_v44 = vpack.c.bf16 %v1681_v24, %v1680_v11 }
 0x666   :  { %2334 = vmatprep.mubr.bf16.mxu0 %v1696_v44 }
 0x667   :  { %2335 = vmatmul.mubr.bf16.vlgmr.msra.gmra.mrb[72].mxu0 %v1697_v35 }
 0x66a   :  { %v2308_v34 = vpop.f32.mrb[76].mxu1 }
 0x66b   :  { %v1626_v7 = vadd.f32 %v2308_v34, %v3223_v47  ;;  %v1617_v26 = vpop.f32.mrb[77].mxu1 }
 0x66c   :  { %v1618_v62 = vadd.f32 %v3223_v47, %v1617_v26  ;;  %v2309_v52 = vpop.f32.mrb[78].mxu1 }
 0x66d   :  { %v1670_v10 = vadd.f32 %v1626_v7, %v3122_v33  ;;  %v1629_v45 = vadd.f32 %v2309_v52, %v3223_v47  ;;  %v1620_v59 = vpop.f32.mrb[79].mxu1 }
 0x66e   :  { %v1668_v12 = vadd.f32 %v1618_v62, %v3127_v29  ;;  %v1621_v54 = vadd.f32 %v3223_v47, %v1620_v59 }
 0x66f   :  { %v1671_v3 = vadd.f32 %v1629_v45, %v3130_v18  ;;  %v1686_v9 = vmax.f32 %v1670_v10, 0.0 }
 0x670   :  { %v1669_v56 = vadd.f32 %v1621_v54, %v3132_v28  ;;  %v1684_v43 = vmax.f32 %v1668_v12, 0.0 }
 0x671   :  { %v1687_v48 = vmax.f32 %v1671_v3, 0.0 }
 0x672   :  { %v1685_v0 = vmax.f32 %v1669_v56, 0.0 }
 0x673   :  { %v1699_v19 = vpack.c.bf16 %v1687_v48, %v1686_v9 }
 0x674   :  { %v1698_v63 = vpack.c.bf16 %v1685_v0, %v1684_v43 }
 0x676   :  { %2338 = vmatprep.mubr.bf16.mxu0 %v1698_v63 }
 0x677   :  { %2339 = vmatmul.mubr.bf16.gmra.mrb[76].mxu0 %v1699_v19 }
 0x67a   :  { %v2312_v33 = vpop.f32.mrb[80].mxu1 }
 0x67b   :  { %v1642_v5 = vadd.f32 %v2312_v33, %v3223_v47  ;;  %v1633_v27 = vpop.f32.mrb[81].mxu1 }
 0x67c   :  { %v1634_v29 = vadd.f32 %v3223_v47, %v1633_v27  ;;  %v2313_v37 = vpop.f32.mrb[82].mxu1 }
 0x67d   :  { %v1674_v55 = vadd.f32 %v1642_v5, %v3150_v1  ;;  %v1645_v18 = vadd.f32 %v2313_v37, %v3223_v47  ;;  %v1636_v28 = vpop.f32.mrb[83].mxu1 }
 0x67e   :  { %v1672_v51 = vadd.f32 %v1634_v29, %v3155_v38  ;;  %v1637_v61 = vadd.f32 %v3223_v47, %v1636_v28 }
 0x67f   :  { %v1675_v57 = vadd.f32 %v1645_v18, %v3158_v6  ;;  %v1690_v25 = vmax.f32 %v1674_v55, 0.0 }
 0x680   :  { %v1673_v50 = vadd.f32 %v1637_v61, %v3160_v42  ;;  %v1688_v21 = vmax.f32 %v1672_v51, 0.0 }
 0x681   :  { %v1691_v23 = vmax.f32 %v1675_v57, 0.0 }
 0x682   :  { %v1689_v40 = vmax.f32 %v1673_v50, 0.0  ;;  %v2316_v2 = vpop.f32.mrb[84].mxu1 }
 0x683   :  { %v1658_v58 = vadd.f32 %v2316_v2, %v3223_v47  ;;  %v1649_v22 = vpop.f32.mrb[85].mxu1  ;;  %v1701_v1 = vpack.c.bf16 %v1691_v23, %v1690_v25 }
 0x684   :  { %v1650_v30 = vadd.f32 %v3223_v47, %v1649_v22  ;;  %v2317_v20 = vpop.f32.mrb[86].mxu1  ;;  %v1700_v17 = vpack.c.bf16 %v1689_v40, %v1688_v21 }
 0x685   :  { %v1678_v38 = vadd.f32 %v1658_v58, %v3178_v13  ;;  %v1661_v31 = vadd.f32 %v2317_v20, %v3223_v47  ;;  %v1652_v6 = vpop.f32.mrb[87].mxu1  ;;  %v2005_v13 = vld [vmem:[#allocation6] ss:$0 sm:$0xff] }
 0x686   :  { %v1676_v42 = vadd.f32 %v1650_v30, %v3183_v60  ;;  %v1653_v53 = vadd.f32 %v3223_v47, %v1652_v6  ;;  %2342 = vmatprep.mubr.bf16.mxu0 %v1700_v17 }
 0x687   :  { %v1679_v4 = vadd.f32 %v1661_v31, %v3186_v49  ;;  %2343 = vmatmul.mubr.bf16.gmra.mrb[80].mxu0 %v1701_v1  ;;  %v1694_v39 = vmax.f32 %v1678_v38, 0.0 }
 0x688   :  { %v1677_v14 = vadd.f32 %v1653_v53, %v3188_v36  ;;  %v1692_v46 = vmax.f32 %v1676_v42, 0.0 }
 0x689   :  { %v1695_v8 = vmax.f32 %v1679_v4, 0.0 }
 0x68a   :  { %v1693_v41 = vmax.f32 %v1677_v14, 0.0 }
 0x68b   :  { %v1703_v15 = vpack.c.bf16 %v1695_v8, %v1694_v39 }
 0x68c   :  { %v1702_v32 = vpack.c.bf16 %v1693_v41, %v1692_v46 }
 0x68e   :  { %2346 = vmatprep.mubr.bf16.mxu0 %v1702_v32 }
 0x68f   :  { %2347 = vmatmul.mubr.bf16.gmra.mrb[84].mxu0 %v1703_v15 }
 0x73a   :  { %v2336_v16 = vpop.f32.mrb[72].mxu0 }
 0x73b   :  { %v1818_v11 = vadd.f32 %v2336_v16, %v2005_v13  ;;  %v1809_v60 = vpop.f32.mrb[73].mxu0 }
 0x73c   :  { %v1810_v24 = vadd.f32 %v2005_v13, %v1809_v60  ;;  %v2337_v47 = vpop.f32.mrb[74].mxu0 }
 0x73d   :  { %1874 = vst [vmem:[%s3314_s9 + $0x10] sm:$0xff] %v1818_v11  ;;  %v1821_v49 = vadd.f32 %v2337_v47, %v2005_v13  ;;  %v1812_v36 = vpop.f32.mrb[75].mxu0 }
 0x73e   :  { %1872 = vst [vmem:[%s3314_s9] sm:$0xff] %v1810_v24  ;;  %v1813_v35 = vadd.f32 %v2005_v13, %v1812_v36 }
 0x73f   :  { %1875 = vst [vmem:[%s3314_s9 + $0x18] sm:$0xff] %v1821_v49 }
 0x740   :  { %1873 = vst [vmem:[%s3314_s9 + $0x8] sm:$0xff] %v1813_v35 }
 0x74a   :  { %v2340_v44 = vpop.f32.mrb[76].mxu0 }
 0x74b   :  { %v1834_v34 = vadd.f32 %v2340_v44, %v2005_v13  ;;  %v1825_v7 = vpop.f32.mrb[77].mxu0 }
 0x74c   :  { %v1826_v26 = vadd.f32 %v2005_v13, %v1825_v7  ;;  %v2341_v62 = vpop.f32.mrb[78].mxu0 }
 0x74d   :  { %1878 = vst [vmem:[%s3314_s9 + $0x30] sm:$0xff] %v1834_v34  ;;  %v1837_v52 = vadd.f32 %v2341_v62, %v2005_v13  ;;  %v1828_v10 = vpop.f32.mrb[79].mxu0 }
 0x74e   :  { %1876 = vst [vmem:[%s3314_s9 + $0x20] sm:$0xff] %v1826_v26  ;;  %v1829_v45 = vadd.f32 %v2005_v13, %v1828_v10 }
 0x74f   :  { %1879 = vst [vmem:[%s3314_s9 + $0x38] sm:$0xff] %v1837_v52 }
 0x750   :  { %1877 = vst [vmem:[%s3314_s9 + $0x28] sm:$0xff] %v1829_v45 }
 0x75a   :  { %v2344_v59 = vpop.f32.mrb[80].mxu0 }
 0x75b   :  { %v1850_v12 = vadd.f32 %v2344_v59, %v2005_v13  ;;  %v1841_v54 = vpop.f32.mrb[81].mxu0 }
 0x75c   :  { %v1842_v3 = vadd.f32 %v2005_v13, %v1841_v54  ;;  %v2345_v56 = vpop.f32.mrb[82].mxu0 }
 0x75d   :  { %1882 = vst [vmem:[%s3314_s9 + $0x50] sm:$0xff] %v1850_v12  ;;  %v1853_v9 = vadd.f32 %v2345_v56, %v2005_v13  ;;  %v1844_v48 = vpop.f32.mrb[83].mxu0 }
 0x75e   :  { %1880 = vst [vmem:[%s3314_s9 + $0x40] sm:$0xff] %v1842_v3  ;;  %v1845_v43 = vadd.f32 %v2005_v13, %v1844_v48 }
 0x75f   :  { %1883 = vst [vmem:[%s3314_s9 + $0x58] sm:$0xff] %v1853_v9 }
 0x760   :  { %1881 = vst [vmem:[%s3314_s9 + $0x48] sm:$0xff] %v1845_v43 }
 0x762   :  { %v2348_v0 = vpop.f32.mrb[84].mxu0 }
 0x763   :  { %v1866_v19 = vadd.f32 %v2348_v0, %v2005_v13  ;;  %v1857_v63 = vpop.f32.mrb[85].mxu0 }
 0x764   :  { %v1858_v33 = vadd.f32 %v2005_v13, %v1857_v63  ;;  %v2349_v5 = vpop.f32.mrb[86].mxu0 }
 0x765   :  { %1886 = vst [vmem:[%s3314_s9 + $0x70] sm:$0xff] %v1866_v19  ;;  %v1869_v27 = vadd.f32 %v2349_v5, %v2005_v13  ;;  %v1860_v29 = vpop.f32.mrb[87].mxu0 }
 0x766   :  { %1884 = vst [vmem:[%s3314_s9 + $0x60] sm:$0xff] %v1858_v33  ;;  %v1861_v37 = vadd.f32 %v2005_v13, %v1860_v29 }
 0x767   :  { %1887 = vst [vmem:[%s3314_s9 + $0x78] sm:$0xff] %v1869_v27 }
 0x768   :  { %1885 = vst [vmem:[%s3314_s9 + $0x68] sm:$0xff] %v1861_v37 }
 0x769   :  { %1892 = vsyncpa [#allocation3], 1 }
 0x76a   :  { %1893 = vsyncpa [#allocation5], 1 }

</bundles_post_ra>
